<compile_context>
chip_gen: v7x
topology: tpu7x:2x2x1
jax: 0.10.0
libtpu: 0.0.40
codegen_flags: <defaults>
</compile_context>

<pallas_src>
import jax
import jax.numpy as jnp
from jax.experimental import pallas as pl
from jax.experimental.pallas import tpu as pltpu

MAX_TILE_M = 1024   # row-tile cap for the conv1 kernel
MAX_TILE_B = 8      # images per block for the fused conv2+MLP kernel


def _round_up(x, m):
    return ((x + m - 1) // m) * m


def _pick_tile_m(M, max_tile=MAX_TILE_M):
    """Largest multiple-of-8 divisor of M that is <= max_tile and gives >= 2 grid
    steps (no ragged blocks, both v7x TensorCores busy).  Falls back to a ragged
    split (Pallas drops out-of-range output rows; rows are independent)."""
    limit = min(max_tile, max(8, M // 2))
    t = (limit // 8) * 8
    while t >= 8:
        if M % t == 0:
            return t
        t -= 8
    if M <= max_tile and M % 8 == 0:
        return M
    return min(max_tile, _round_up(pl.cdiv(M, 2), 8))


# ----------------------------------------------------------------------------
# Pallas kernels
# ----------------------------------------------------------------------------
def _conv_relu_pool_kernel(p0_ref, p1_ref, p2_ref, p3_ref, w_ref, b_ref, o_ref):
    """conv1 (im2col matmul) + bias + ReLU + 2x2 maxpool.

    p*_ref: [tm, 75] im2col patches for the 4 pool quadrants (same output pixels),
    w_ref: [75, 8], b_ref: [1, 8].  Output: pooled activations [tm, 8].
    """
    w = w_ref[...]
    b = b_ref[...]

    def quad(p_ref):
        acc = jnp.dot(p_ref[...], w, preferred_element_type=jnp.float32) + b
        return jnp.maximum(acc, 0.0)             # ReLU commutes with the pool max

    o_ref[...] = jnp.maximum(jnp.maximum(quad(p0_ref), quad(p1_ref)),
                             jnp.maximum(quad(p2_ref), quad(p3_ref)))


def _conv2_mlp_kernel(p0_ref, p1_ref, p2_ref, p3_ref, w2_ref, b2_ref,
                      w1f_ref, b1f_ref, w2f_ref, b2f_ref, w3f_ref, b3f_ref,
                      o_ref, a2_ref):
    """conv2 + bias + ReLU + 2x2 maxpool + fc1 + ReLU + fc2 + ReLU + fc3, fused.

    p*_ref: [tb, 25, 150] conv2 pool-quadrant patches, w2_ref: [150, 16],
    w1f_ref: [25, 16, 128] (fc1 in channels-last order), fc weights 128-padded.
    Output block: [tb, 1, 128] (lanes 0..9 are the logits).
    """
    tb = o_ref.shape[0]
    w2 = w2_ref[...]
    b2 = b2_ref[...]

    # conv2 + bias + ReLU + maxpool, one image at a time (2-D MXU matmuls).
    for t in range(tb):
        def quad(p_ref):
            acc = jnp.dot(p_ref[t], w2, preferred_element_type=jnp.float32) + b2
            return jnp.maximum(acc, 0.0)

        a2_ref[t] = jnp.maximum(jnp.maximum(quad(p0_ref), quad(p1_ref)),
                                jnp.maximum(quad(p2_ref), quad(p3_ref)))  # [25, 16]

    # fc1: contract over (spatial s, channel c) as 25 accumulated [tb,16]@[16,128].
    h = jnp.zeros((tb, 128), jnp.float32)
    for s in range(25):
        h = h + jnp.dot(a2_ref[:, s, :], w1f_ref[s],
                        preferred_element_type=jnp.float32)
    h = jnp.maximum(h + b1f_ref[...], 0.0)
    h = jnp.maximum(jnp.dot(h, w2f_ref[...], preferred_element_type=jnp.float32)
                    + b2f_ref[...], 0.0)
    y = jnp.dot(h, w3f_ref[...], preferred_element_type=jnp.float32) + b3f_ref[...]
    o_ref[:, 0, :] = y                           # lane-dense [tb, 128] store


# ----------------------------------------------------------------------------
# Pallas wrappers
# ----------------------------------------------------------------------------
def _conv1_call(patches, w, b):
    M, K = patches[0].shape
    N = w.shape[1]
    tm = _pick_tile_m(M)
    grid_m = pl.cdiv(M, tm)
    return pl.pallas_call(
        _conv_relu_pool_kernel,
        out_shape=jax.ShapeDtypeStruct((M, N), jnp.float32),
        grid=(grid_m,),
        in_specs=[pl.BlockSpec((tm, K), lambda i: (i, 0))] * 4
        + [pl.BlockSpec((K, N), lambda i: (0, 0)),
           pl.BlockSpec((1, N), lambda i: (0, 0))],
        out_specs=pl.BlockSpec((tm, N), lambda i: (i, 0)),
        compiler_params=pltpu.CompilerParams(dimension_semantics=("parallel",)),
    )(*patches, w, b)


def _conv2_mlp_call(patches, p):
    B = patches[0].shape[0]
    tb = max(1, min(MAX_TILE_B, B // 2))         # >= 2 grid steps whenever B >= 2
    grid_b = pl.cdiv(B, tb)
    out = pl.pallas_call(
        _conv2_mlp_kernel,
        out_shape=jax.ShapeDtypeStruct((B, 1, 128), jnp.float32),
        grid=(grid_b,),
        in_specs=[pl.BlockSpec((tb, 25, 150), lambda i: (i, 0, 0))] * 4
        + [pl.BlockSpec((150, 16), lambda i: (0, 0)),
           pl.BlockSpec((1, 16), lambda i: (0, 0)),
           pl.BlockSpec((25, 16, 128), lambda i: (0, 0, 0)),
           pl.BlockSpec((1, 128), lambda i: (0, 0)),
           pl.BlockSpec((128, 128), lambda i: (0, 0)),
           pl.BlockSpec((1, 128), lambda i: (0, 0)),
           pl.BlockSpec((128, 128), lambda i: (0, 0)),
           pl.BlockSpec((1, 128), lambda i: (0, 0))],
        out_specs=pl.BlockSpec((tb, 1, 128), lambda i: (i, 0, 0)),
        scratch_shapes=[pltpu.VMEM((tb, 25, 16), jnp.float32)],
        compiler_params=pltpu.CompilerParams(dimension_semantics=("parallel",)),
    )(*patches, p["w2"], p["b2"], p["fc1_w"], p["fc1_b"],
      p["fc2_w"], p["fc2_b"], p["fc3_w"], p["fc3_b"])
    return out[:, 0, :10]


# ----------------------------------------------------------------------------
# Glue: pool-grouped im2col (channels-last strided slices; no K zero-padding)
# ----------------------------------------------------------------------------
def _pool_grouped_patches(x, ksize):
    """x: [B, H, W, C] channels-last -> 4 patch tensors [B, Hp*Wp, ksize*ksize*C]
    (one per 2x2-pool quadrant).  Patch columns are ordered (kh, kw, c); row
    r = ph*Wp + pw is the patch of conv-output pixel (2*ph + dh, 2*pw + dw), so
    the pool becomes an elementwise max of the 4 quadrant matmuls in-kernel."""
    B, H, W, C = x.shape
    Hp = (H - ksize + 1) // 2
    Wp = (W - ksize + 1) // 2
    K = ksize * ksize * C
    quads = []
    for dh in (0, 1):
        for dw in (0, 1):
            cols = [
                x[:, dh + kh: dh + kh + 2 * Hp - 1: 2,
                     dw + kw: dw + kw + 2 * Wp - 1: 2, :]
                for kh in range(ksize) for kw in range(ksize)
            ]
            quads.append(jnp.concatenate(cols, axis=-1).reshape(B, Hp * Wp, K))
    return quads


# ----------------------------------------------------------------------------
# Model: parameters (PyTorch layout) + one-time repack + forward
# ----------------------------------------------------------------------------
def init_params(key):
    def uniform(key, shape, fan_in):
        bound = 1.0 / jnp.sqrt(fan_in)
        return jax.random.uniform(key, shape, jnp.float32, -bound, bound)

    ks = jax.random.split(key, 10)
    return {
        "conv1_w": uniform(ks[0], (6, 3, 5, 5), 3 * 5 * 5),
        "conv1_b": uniform(ks[1], (6,), 3 * 5 * 5),
        "conv2_w": uniform(ks[2], (16, 6, 5, 5), 6 * 5 * 5),
        "conv2_b": uniform(ks[3], (16,), 6 * 5 * 5),
        "fc1_w": uniform(ks[4], (400, 120), 400),   # rows in PyTorch flatten order (c,h,w)
        "fc1_b": uniform(ks[5], (120,), 400),
        "fc2_w": uniform(ks[6], (120, 84), 120),
        "fc2_b": uniform(ks[7], (84,), 120),
        "fc3_w": uniform(ks[8], (84, 10), 84),
        "fc3_b": uniform(ks[9], (10,), 84),
    }


def prepare_params(p):
    """One-time repack: conv weights -> (kh,kw,ci)xCout im2col matrices; fc1 permuted
    from the torch (c,h,w) flatten order to (spatial s, channel c); fc weights padded
    to 128 lanes once (no per-call padding)."""
    def pad2(a, rows, cols):
        return jnp.zeros((rows, cols), jnp.float32).at[: a.shape[0], : a.shape[1]].set(a)

    w1 = p["conv1_w"].transpose(2, 3, 1, 0).reshape(75, 6)      # (kh,kw,ci) x co
    w2 = p["conv2_w"].transpose(2, 3, 1, 0).reshape(150, 16)

    # fc1: torch flatten index c*25 + h*5 + w  ->  [s = h*5+w, c, co]
    f1 = p["fc1_w"].reshape(16, 5, 5, 120).transpose(1, 2, 0, 3).reshape(25, 16, 120)
    fc1 = jnp.zeros((25, 16, 128), jnp.float32).at[:, :, :120].set(f1)

    return {
        "w1": pad2(w1, 75, 8), "b1": pad2(p["conv1_b"].reshape(1, 6), 1, 8),
        "w2": w2, "b2": p["conv2_b"].reshape(1, 16),
        "fc1_w": fc1, "fc1_b": pad2(p["fc1_b"].reshape(1, 120), 1, 128),
        "fc2_w": pad2(p["fc2_w"], 128, 128),
        "fc2_b": pad2(p["fc2_b"].reshape(1, 84), 1, 128),
        "fc3_w": pad2(p["fc3_w"], 128, 128),
        "fc3_b": pad2(p["fc3_b"].reshape(1, 10), 1, 128),
    }


def net_forward(params, x):
    """x: [B, 3, 32, 32] NCHW float32 -> logits [B, 10] (matches torch Net.forward)."""
    B = x.shape[0]
    x = jnp.transpose(x, (0, 2, 3, 1))                           # NCHW -> NHWC once
    # stage 1: conv1(3->6, 5x5) + bias + ReLU + 2x2 maxpool  (fused kernel, 8-lane out)
    q1 = [q.reshape(B * 196, 75) for q in _pool_grouped_patches(x, 5)]
    a1 = _conv1_call(q1, params["w1"], params["b1"])             # [B*196, 8]
    # stage 2 + fc head: conv2 + ReLU + pool + fc1 + ReLU + fc2 + ReLU + fc3,
    # all in one fused kernel gridded over image blocks.
    y1 = a1.reshape(B, 14, 14, 8)[:, :, :, :6]
    q2 = _pool_grouped_patches(y1, 5)                            # 4 x [B, 25, 150]
    return _conv2_mlp_call(q2, params)                           # [B, 10]


if __name__ == "__main__":
    key = jax.random.PRNGKey(0)
    k_param, k_x = jax.random.split(key)
    params = prepare_params(init_params(k_param))    # pad / permute weights ONCE
    # CIFAR-like input: fc1's 16*5*5 input dim implies 3x32x32 images.
    x = jax.random.normal(k_x, (2, 3, 32, 32), dtype=jnp.float32)

    fwd = jax.jit(net_forward)
    out = jax.block_until_ready(fwd(params, x))
    assert out.shape == (2, 10) and out.dtype == jnp.float32
    assert bool(jnp.isfinite(out).all())
    print("KERNEL_OK")
</pallas_src>

<mosaic_0001>
module attributes {stable_mosaic.version = 11 : i64} {
  func.func @_conv_relu_pool_kernel(%arg0: i32, %arg1: memref<56x75xf32, #tpu.memory_space<vmem>>, %arg2: memref<56x75xf32, #tpu.memory_space<vmem>>, %arg3: memref<56x75xf32, #tpu.memory_space<vmem>>, %arg4: memref<56x75xf32, #tpu.memory_space<vmem>>, %arg5: memref<75x8xf32, #tpu.memory_space<vmem>>, %arg6: memref<1x8xf32, #tpu.memory_space<vmem>>, %arg7: memref<56x8xf32, #tpu.memory_space<vmem>>) attributes {dimension_semantics = [#tpu.dimension_semantics<parallel>], iteration_bounds = array<i64: 7>, scalar_prefetch = 0 : i64, scratch_operands = 0 : i64, tpu.core_type = #tpu.core_type<tc>, window_params = [{transform_indices = @transform_0, window_bounds = array<i64: 56, 75>}, {transform_indices = @transform_1, window_bounds = array<i64: 56, 75>}, {transform_indices = @transform_2, window_bounds = array<i64: 56, 75>}, {transform_indices = @transform_3, window_bounds = array<i64: 56, 75>}, {pipeline_mode = #tpu.pipeline_mode<synchronous>, transform_indices = @transform_4, window_bounds = array<i64: 75, 8>}, {pipeline_mode = #tpu.pipeline_mode<synchronous>, transform_indices = @transform_5, window_bounds = array<i64: 1, 8>}, {transform_indices = @transform_6, window_bounds = array<i64: 56, 8>}]} {
    %c0 = arith.constant 0 : index
    %c0_0 = arith.constant 0 : index
    %0 = vector.load %arg5[%c0, %c0_0] : memref<75x8xf32, #tpu.memory_space<vmem>>, vector<75x8xf32>
    %c0_1 = arith.constant 0 : index
    %c0_2 = arith.constant 0 : index
    %1 = vector.load %arg6[%c0_1, %c0_2] : memref<1x8xf32, #tpu.memory_space<vmem>>, vector<1x8xf32>
    %c0_3 = arith.constant 0 : index
    %c0_4 = arith.constant 0 : index
    %2 = vector.load %arg1[%c0_3, %c0_4] : memref<56x75xf32, #tpu.memory_space<vmem>>, vector<56x75xf32>
    %cst = arith.constant dense<0.000000e+00> : vector<56x8xf32>
    %3 = tpu.matmul %2, %0, %cst {dimension_numbers = #tpu.dot_dimension_numbers<[1], [0], [0], [1], [0, 0, 1, 1], [], []>} : vector<56x75xf32>, vector<75x8xf32>, vector<56x8xf32> -> vector<56x8xf32>
    %4 = vector.broadcast %1 : vector<1x8xf32> to vector<56x8xf32>
    %5 = arith.addf %3, %4 : vector<56x8xf32>
    %cst_5 = arith.constant 0.000000e+00 : f32
    %6 = vector.broadcast %cst_5 : f32 to vector<56x8xf32>
    %7 = arith.maximumf %5, %6 : vector<56x8xf32>
    %c0_6 = arith.constant 0 : index
    %c0_7 = arith.constant 0 : index
    %8 = vector.load %arg2[%c0_6, %c0_7] : memref<56x75xf32, #tpu.memory_space<vmem>>, vector<56x75xf32>
    %cst_8 = arith.constant dense<0.000000e+00> : vector<56x8xf32>
    %9 = tpu.matmul %8, %0, %cst_8 {dimension_numbers = #tpu.dot_dimension_numbers<[1], [0], [0], [1], [0, 0, 1, 1], [], []>} : vector<56x75xf32>, vector<75x8xf32>, vector<56x8xf32> -> vector<56x8xf32>
    %10 = vector.broadcast %1 : vector<1x8xf32> to vector<56x8xf32>
    %11 = arith.addf %9, %10 : vector<56x8xf32>
    %cst_9 = arith.constant 0.000000e+00 : f32
    %12 = vector.broadcast %cst_9 : f32 to vector<56x8xf32>
    %13 = arith.maximumf %11, %12 : vector<56x8xf32>
    %14 = arith.maximumf %7, %13 : vector<56x8xf32>
    %c0_10 = arith.constant 0 : index
    %c0_11 = arith.constant 0 : index
    %15 = vector.load %arg3[%c0_10, %c0_11] : memref<56x75xf32, #tpu.memory_space<vmem>>, vector<56x75xf32>
    %cst_12 = arith.constant dense<0.000000e+00> : vector<56x8xf32>
    %16 = tpu.matmul %15, %0, %cst_12 {dimension_numbers = #tpu.dot_dimension_numbers<[1], [0], [0], [1], [0, 0, 1, 1], [], []>} : vector<56x75xf32>, vector<75x8xf32>, vector<56x8xf32> -> vector<56x8xf32>
    %17 = vector.broadcast %1 : vector<1x8xf32> to vector<56x8xf32>
    %18 = arith.addf %16, %17 : vector<56x8xf32>
    %cst_13 = arith.constant 0.000000e+00 : f32
    %19 = vector.broadcast %cst_13 : f32 to vector<56x8xf32>
    %20 = arith.maximumf %18, %19 : vector<56x8xf32>
    %c0_14 = arith.constant 0 : index
    %c0_15 = arith.constant 0 : index
    %21 = vector.load %arg4[%c0_14, %c0_15] : memref<56x75xf32, #tpu.memory_space<vmem>>, vector<56x75xf32>
    %cst_16 = arith.constant dense<0.000000e+00> : vector<56x8xf32>
    %22 = tpu.matmul %21, %0, %cst_16 {dimension_numbers = #tpu.dot_dimension_numbers<[1], [0], [0], [1], [0, 0, 1, 1], [], []>} : vector<56x75xf32>, vector<75x8xf32>, vector<56x8xf32> -> vector<56x8xf32>
    %23 = vector.broadcast %1 : vector<1x8xf32> to vector<56x8xf32>
    %24 = arith.addf %22, %23 : vector<56x8xf32>
    %cst_17 = arith.constant 0.000000e+00 : f32
    %25 = vector.broadcast %cst_17 : f32 to vector<56x8xf32>
    %26 = arith.maximumf %24, %25 : vector<56x8xf32>
    %27 = arith.maximumf %20, %26 : vector<56x8xf32>
    %28 = arith.maximumf %14, %27 : vector<56x8xf32>
    %c0_18 = arith.constant 0 : index
    %c0_19 = arith.constant 0 : index
    %29 = vector.load %arg7[%c0_18, %c0_19] : memref<56x8xf32, #tpu.memory_space<vmem>>, vector<56x8xf32>
    tpu.vector_store %arg7[%c0_18, %c0_19], %28 {strides = array<i32>} : memref<56x8xf32, #tpu.memory_space<vmem>>, vector<56x8xf32>,
    return
  }
  func.func @transform_0(%arg0: i32) -> (i32, i32) {
    %c0_i32 = arith.constant 0 : i32
    %c0_i32_0 = arith.constant 0 : i32
    return %arg0, %c0_i32 : i32, i32
  }
  func.func @transform_1(%arg0: i32) -> (i32, i32) {
    %c0_i32 = arith.constant 0 : i32
    %c0_i32_0 = arith.constant 0 : i32
    return %arg0, %c0_i32 : i32, i32
  }
  func.func @transform_2(%arg0: i32) -> (i32, i32) {
    %c0_i32 = arith.constant 0 : i32
    %c0_i32_0 = arith.constant 0 : i32
    return %arg0, %c0_i32 : i32, i32
  }
  func.func @transform_3(%arg0: i32) -> (i32, i32) {
    %c0_i32 = arith.constant 0 : i32
    %c0_i32_0 = arith.constant 0 : i32
    return %arg0, %c0_i32 : i32, i32
  }
  func.func @transform_4(%arg0: i32) -> (i32, i32) {
    %c0_i32 = arith.constant 0 : i32
    %c0_i32_0 = arith.constant 0 : i32
    %c0_i32_1 = arith.constant 0 : i32
    return %c0_i32, %c0_i32_0 : i32, i32
  }
  func.func @transform_5(%arg0: i32) -> (i32, i32) {
    %c0_i32 = arith.constant 0 : i32
    %c0_i32_0 = arith.constant 0 : i32
    %c0_i32_1 = arith.constant 0 : i32
    return %c0_i32, %c0_i32_0 : i32, i32
  }
  func.func @transform_6(%arg0: i32) -> (i32, i32) {
    %c0_i32 = arith.constant 0 : i32
    %c0_i32_0 = arith.constant 0 : i32
    return %arg0, %c0_i32 : i32, i32
  }
}

module attributes {stable_mosaic.version = 11 : i64} {
  func.func @_conv2_mlp_kernel(%arg0: i32, %arg1: memref<1x25x150xf32, #tpu.memory_space<vmem>>, %arg2: memref<1x25x150xf32, #tpu.memory_space<vmem>>, %arg3: memref<1x25x150xf32, #tpu.memory_space<vmem>>, %arg4: memref<1x25x150xf32, #tpu.memory_space<vmem>>, %arg5: memref<150x16xf32, #tpu.memory_space<vmem>>, %arg6: memref<1x16xf32, #tpu.memory_space<vmem>>, %arg7: memref<25x16x128xf32, #tpu.memory_space<vmem>>, %arg8: memref<1x128xf32, #tpu.memory_space<vmem>>, %arg9: memref<128x128xf32, #tpu.memory_space<vmem>>, %arg10: memref<1x128xf32, #tpu.memory_space<vmem>>, %arg11: memref<128x128xf32, #tpu.memory_space<vmem>>, %arg12: memref<1x128xf32, #tpu.memory_space<vmem>>, %arg13: memref<1x1x128xf32, #tpu.memory_space<vmem>>, %arg14: memref<1x25x16xf32, #tpu.memory_space<vmem>>) attributes {dimension_semantics = [#tpu.dimension_semantics<parallel>], iteration_bounds = array<i64: 2>, scalar_prefetch = 0 : i64, scratch_operands = 1 : i64, tpu.core_type = #tpu.core_type<tc>, window_params = [{transform_indices = @transform_0, window_bounds = array<i64: 1, 25, 150>}, {transform_indices = @transform_1, window_bounds = array<i64: 1, 25, 150>}, {transform_indices = @transform_2, window_bounds = array<i64: 1, 25, 150>}, {transform_indices = @transform_3, window_bounds = array<i64: 1, 25, 150>}, {pipeline_mode = #tpu.pipeline_mode<synchronous>, transform_indices = @transform_4, window_bounds = array<i64: 150, 16>}, {pipeline_mode = #tpu.pipeline_mode<synchronous>, transform_indices = @transform_5, window_bounds = array<i64: 1, 16>}, {pipeline_mode = #tpu.pipeline_mode<synchronous>, transform_indices = @transform_6, window_bounds = array<i64: 25, 16, 128>}, {pipeline_mode = #tpu.pipeline_mode<synchronous>, transform_indices = @transform_7, window_bounds = array<i64: 1, 128>}, {pipeline_mode = #tpu.pipeline_mode<synchronous>, transform_indices = @transform_8, window_bounds = array<i64: 128, 128>}, {pipeline_mode = #tpu.pipeline_mode<synchronous>, transform_indices = @transform_9, window_bounds = array<i64: 1, 128>}, {pipeline_mode = #tpu.pipeline_mode<synchronous>, transform_indices = @transform_10, window_bounds = array<i64: 128, 128>}, {pipeline_mode = #tpu.pipeline_mode<synchronous>, transform_indices = @transform_11, window_bounds = array<i64: 1, 128>}, {transform_indices = @transform_12, window_bounds = array<i64: 1, 1, 128>}]} {
    %c0 = arith.constant 0 : index
    %c0_0 = arith.constant 0 : index
    %0 = vector.load %arg5[%c0, %c0_0] : memref<150x16xf32, #tpu.memory_space<vmem>>, vector<150x16xf32>
    %c0_1 = arith.constant 0 : index
    %c0_2 = arith.constant 0 : index
    %1 = vector.load %arg6[%c0_1, %c0_2] : memref<1x16xf32, #tpu.memory_space<vmem>>, vector<1x16xf32>
    %c0_3 = arith.constant 0 : index
    %c0_4 = arith.constant 0 : index
    %c0_5 = arith.constant 0 : index
    %2 = vector.load %arg1[%c0_3, %c0_4, %c0_5] : memref<1x25x150xf32, #tpu.memory_space<vmem>>, vector<1x25x150xf32>
    %3 = vector.shape_cast %2 : vector<1x25x150xf32> to vector<25x150xf32>
    %cst = arith.constant dense<0.000000e+00> : vector<25x16xf32>
    %4 = tpu.matmul %3, %0, %cst {dimension_numbers = #tpu.dot_dimension_numbers<[1], [0], [0], [1], [0, 0, 1, 1], [], []>} : vector<25x150xf32>, vector<150x16xf32>, vector<25x16xf32> -> vector<25x16xf32>
    %5 = vector.broadcast %1 : vector<1x16xf32> to vector<25x16xf32>
    %6 = arith.addf %4, %5 : vector<25x16xf32>
    %cst_6 = arith.constant 0.000000e+00 : f32
    %7 = vector.broadcast %cst_6 : f32 to vector<25x16xf32>
    %8 = arith.maximumf %6, %7 : vector<25x16xf32>
    %c0_7 = arith.constant 0 : index
    %c0_8 = arith.constant 0 : index
    %c0_9 = arith.constant 0 : index
    %9 = vector.load %arg2[%c0_7, %c0_8, %c0_9] : memref<1x25x150xf32, #tpu.memory_space<vmem>>, vector<1x25x150xf32>
    %10 = vector.shape_cast %9 : vector<1x25x150xf32> to vector<25x150xf32>
    %cst_10 = arith.constant dense<0.000000e+00> : vector<25x16xf32>
    %11 = tpu.matmul %10, %0, %cst_10 {dimension_numbers = #tpu.dot_dimension_numbers<[1], [0], [0], [1], [0, 0, 1, 1], [], []>} : vector<25x150xf32>, vector<150x16xf32>, vector<25x16xf32> -> vector<25x16xf32>
    %12 = vector.broadcast %1 : vector<1x16xf32> to vector<25x16xf32>
    %13 = arith.addf %11, %12 : vector<25x16xf32>
    %cst_11 = arith.constant 0.000000e+00 : f32
    %14 = vector.broadcast %cst_11 : f32 to vector<25x16xf32>
    %15 = arith.maximumf %13, %14 : vector<25x16xf32>
    %16 = arith.maximumf %8, %15 : vector<25x16xf32>
    %c0_12 = arith.constant 0 : index
    %c0_13 = arith.constant 0 : index
    %c0_14 = arith.constant 0 : index
    %17 = vector.load %arg3[%c0_12, %c0_13, %c0_14] : memref<1x25x150xf32, #tpu.memory_space<vmem>>, vector<1x25x150xf32>
    %18 = vector.shape_cast %17 : vector<1x25x150xf32> to vector<25x150xf32>
    %cst_15 = arith.constant dense<0.000000e+00> : vector<25x16xf32>
    %19 = tpu.matmul %18, %0, %cst_15 {dimension_numbers = #tpu.dot_dimension_numbers<[1], [0], [0], [1], [0, 0, 1, 1], [], []>} : vector<25x150xf32>, vector<150x16xf32>, vector<25x16xf32> -> vector<25x16xf32>
    %20 = vector.broadcast %1 : vector<1x16xf32> to vector<25x16xf32>
    %21 = arith.addf %19, %20 : vector<25x16xf32>
    %cst_16 = arith.constant 0.000000e+00 : f32
    %22 = vector.broadcast %cst_16 : f32 to vector<25x16xf32>
    %23 = arith.maximumf %21, %22 : vector<25x16xf32>
    %c0_17 = arith.constant 0 : index
    %c0_18 = arith.constant 0 : index
    %c0_19 = arith.constant 0 : index
    %24 = vector.load %arg4[%c0_17, %c0_18, %c0_19] : memref<1x25x150xf32, #tpu.memory_space<vmem>>, vector<1x25x150xf32>
    %25 = vector.shape_cast %24 : vector<1x25x150xf32> to vector<25x150xf32>
    %cst_20 = arith.constant dense<0.000000e+00> : vector<25x16xf32>
    %26 = tpu.matmul %25, %0, %cst_20 {dimension_numbers = #tpu.dot_dimension_numbers<[1], [0], [0], [1], [0, 0, 1, 1], [], []>} : vector<25x150xf32>, vector<150x16xf32>, vector<25x16xf32> -> vector<25x16xf32>
    %27 = vector.broadcast %1 : vector<1x16xf32> to vector<25x16xf32>
    %28 = arith.addf %26, %27 : vector<25x16xf32>
    %cst_21 = arith.constant 0.000000e+00 : f32
    %29 = vector.broadcast %cst_21 : f32 to vector<25x16xf32>
    %30 = arith.maximumf %28, %29 : vector<25x16xf32>
    %31 = arith.maximumf %23, %30 : vector<25x16xf32>
    %32 = arith.maximumf %16, %31 : vector<25x16xf32>
    %c0_22 = arith.constant 0 : index
    %c0_23 = arith.constant 0 : index
    %c0_24 = arith.constant 0 : index
    %33 = vector.load %arg14[%c0_22, %c0_23, %c0_24] : memref<1x25x16xf32, #tpu.memory_space<vmem>>, vector<1x25x16xf32>
    %34 = vector.shape_cast %33 : vector<1x25x16xf32> to vector<25x16xf32>
    %35 = vector.shape_cast %32 : vector<25x16xf32> to vector<1x25x16xf32>
    tpu.vector_store %arg14[%c0_22, %c0_23, %c0_24], %35 {strides = array<i32>} : memref<1x25x16xf32, #tpu.memory_space<vmem>>, vector<1x25x16xf32>,
    %cst_25 = arith.constant 0.000000e+00 : f32
    %36 = vector.broadcast %cst_25 : f32 to vector<1x128xf32>
    %c0_26 = arith.constant 0 : index
    %c0_27 = arith.constant 0 : index
    %c0_28 = arith.constant 0 : index
    %37 = vector.load %arg14[%c0_26, %c0_27, %c0_28] : memref<1x25x16xf32, #tpu.memory_space<vmem>>, vector<1x1x16xf32>
    %38 = vector.shape_cast %37 : vector<1x1x16xf32> to vector<1x16xf32>
    %c0_29 = arith.constant 0 : index
    %c0_30 = arith.constant 0 : index
    %c0_31 = arith.constant 0 : index
    %39 = vector.load %arg7[%c0_29, %c0_30, %c0_31] : memref<25x16x128xf32, #tpu.memory_space<vmem>>, vector<1x16x128xf32>
    %40 = vector.shape_cast %39 : vector<1x16x128xf32> to vector<16x128xf32>
    %cst_32 = arith.constant dense<0.000000e+00> : vector<1x128xf32>
    %41 = tpu.matmul %38, %40, %cst_32 {dimension_numbers = #tpu.dot_dimension_numbers<[1], [0], [0], [1], [0, 0, 1, 1], [], []>} : vector<1x16xf32>, vector<16x128xf32>, vector<1x128xf32> -> vector<1x128xf32>
    %42 = arith.addf %36, %41 : vector<1x128xf32>
    %c0_33 = arith.constant 0 : index
    %c1 = arith.constant 1 : index
    %c0_34 = arith.constant 0 : index
    %43 = vector.load %arg14[%c0_33, %c1, %c0_34] : memref<1x25x16xf32, #tpu.memory_space<vmem>>, vector<1x1x16xf32>
    %44 = vector.shape_cast %43 : vector<1x1x16xf32> to vector<1x16xf32>
    %c1_35 = arith.constant 1 : index
    %c0_36 = arith.constant 0 : index
    %c0_37 = arith.constant 0 : index
    %45 = vector.load %arg7[%c1_35, %c0_36, %c0_37] : memref<25x16x128xf32, #tpu.memory_space<vmem>>, vector<1x16x128xf32>
    %46 = vector.shape_cast %45 : vector<1x16x128xf32> to vector<16x128xf32>
    %cst_38 = arith.constant dense<0.000000e+00> : vector<1x128xf32>
    %47 = tpu.matmul %44, %46, %cst_38 {dimension_numbers = #tpu.dot_dimension_numbers<[1], [0], [0], [1], [0, 0, 1, 1], [], []>} : vector<1x16xf32>, vector<16x128xf32>, vector<1x128xf32> -> vector<1x128xf32>
    %48 = arith.addf %42, %47 : vector<1x128xf32>
    %c0_39 = arith.constant 0 : index
    %c2 = arith.constant 2 : index
    %c0_40 = arith.constant 0 : index
    %49 = vector.load %arg14[%c0_39, %c2, %c0_40] : memref<1x25x16xf32, #tpu.memory_space<vmem>>, vector<1x1x16xf32>
    %50 = vector.shape_cast %49 : vector<1x1x16xf32> to vector<1x16xf32>
    %c2_41 = arith.constant 2 : index
    %c0_42 = arith.constant 0 : index
    %c0_43 = arith.constant 0 : index
    %51 = vector.load %arg7[%c2_41, %c0_42, %c0_43] : memref<25x16x128xf32, #tpu.memory_space<vmem>>, vector<1x16x128xf32>
    %52 = vector.shape_cast %51 : vector<1x16x128xf32> to vector<16x128xf32>
    %cst_44 = arith.constant dense<0.000000e+00> : vector<1x128xf32>
    %53 = tpu.matmul %50, %52, %cst_44 {dimension_numbers = #tpu.dot_dimension_numbers<[1], [0], [0], [1], [0, 0, 1, 1], [], []>} : vector<1x16xf32>, vector<16x128xf32>, vector<1x128xf32> -> vector<1x128xf32>
    %54 = arith.addf %48, %53 : vector<1x128xf32>
    %c0_45 = arith.constant 0 : index
    %c3 = arith.constant 3 : index
    %c0_46 = arith.constant 0 : index
    %55 = vector.load %arg14[%c0_45, %c3, %c0_46] : memref<1x25x16xf32, #tpu.memory_space<vmem>>, vector<1x1x16xf32>
    %56 = vector.shape_cast %55 : vector<1x1x16xf32> to vector<1x16xf32>
    %c3_47 = arith.constant 3 : index
    %c0_48 = arith.constant 0 : index
    %c0_49 = arith.constant 0 : index
    %57 = vector.load %arg7[%c3_47, %c0_48, %c0_49] : memref<25x16x128xf32, #tpu.memory_space<vmem>>, vector<1x16x128xf32>
    %58 = vector.shape_cast %57 : vector<1x16x128xf32> to vector<16x128xf32>
    %cst_50 = arith.constant dense<0.000000e+00> : vector<1x128xf32>
    %59 = tpu.matmul %56, %58, %cst_50 {dimension_numbers = #tpu.dot_dimension_numbers<[1], [0], [0], [1], [0, 0, 1, 1], [], []>} : vector<1x16xf32>, vector<16x128xf32>, vector<1x128xf32> -> vector<1x128xf32>
    %60 = arith.addf %54, %59 : vector<1x128xf32>
    %c0_51 = arith.constant 0 : index
    %c4 = arith.constant 4 : index
    %c0_52 = arith.constant 0 : index
    %61 = vector.load %arg14[%c0_51, %c4, %c0_52] : memref<1x25x16xf32, #tpu.memory_space<vmem>>, vector<1x1x16xf32>
    %62 = vector.shape_cast %61 : vector<1x1x16xf32> to vector<1x16xf32>
    %c4_53 = arith.constant 4 : index
    %c0_54 = arith.constant 0 : index
    %c0_55 = arith.constant 0 : index
    %63 = vector.load %arg7[%c4_53, %c0_54, %c0_55] : memref<25x16x128xf32, #tpu.memory_space<vmem>>, vector<1x16x128xf32>
    %64 = vector.shape_cast %63 : vector<1x16x128xf32> to vector<16x128xf32>
    %cst_56 = arith.constant dense<0.000000e+00> : vector<1x128xf32>
    %65 = tpu.matmul %62, %64, %cst_56 {dimension_numbers = #tpu.dot_dimension_numbers<[1], [0], [0], [1], [0, 0, 1, 1], [], []>} : vector<1x16xf32>, vector<16x128xf32>, vector<1x128xf32> -> vector<1x128xf32>
    %66 = arith.addf %60, %65 : vector<1x128xf32>
    %c0_57 = arith.constant 0 : index
    %c5 = arith.constant 5 : index
    %c0_58 = arith.constant 0 : index
    %67 = vector.load %arg14[%c0_57, %c5, %c0_58] : memref<1x25x16xf32, #tpu.memory_space<vmem>>, vector<1x1x16xf32>
    %68 = vector.shape_cast %67 : vector<1x1x16xf32> to vector<1x16xf32>
    %c5_59 = arith.constant 5 : index
    %c0_60 = arith.constant 0 : index
    %c0_61 = arith.constant 0 : index
    %69 = vector.load %arg7[%c5_59, %c0_60, %c0_61] : memref<25x16x128xf32, #tpu.memory_space<vmem>>, vector<1x16x128xf32>
    %70 = vector.shape_cast %69 : vector<1x16x128xf32> to vector<16x128xf32>
    %cst_62 = arith.constant dense<0.000000e+00> : vector<1x128xf32>
    %71 = tpu.matmul %68, %70, %cst_62 {dimension_numbers = #tpu.dot_dimension_numbers<[1], [0], [0], [1], [0, 0, 1, 1], [], []>} : vector<1x16xf32>, vector<16x128xf32>, vector<1x128xf32> -> vector<1x128xf32>
    %72 = arith.addf %66, %71 : vector<1x128xf32>
    %c0_63 = arith.constant 0 : index
    %c6 = arith.constant 6 : index
    %c0_64 = arith.constant 0 : index
    %73 = vector.load %arg14[%c0_63, %c6, %c0_64] : memref<1x25x16xf32, #tpu.memory_space<vmem>>, vector<1x1x16xf32>
    %74 = vector.shape_cast %73 : vector<1x1x16xf32> to vector<1x16xf32>
    %c6_65 = arith.constant 6 : index
    %c0_66 = arith.constant 0 : index
    %c0_67 = arith.constant 0 : index
    %75 = vector.load %arg7[%c6_65, %c0_66, %c0_67] : memref<25x16x128xf32, #tpu.memory_space<vmem>>, vector<1x16x128xf32>
    %76 = vector.shape_cast %75 : vector<1x16x128xf32> to vector<16x128xf32>
    %cst_68 = arith.constant dense<0.000000e+00> : vector<1x128xf32>
    %77 = tpu.matmul %74, %76, %cst_68 {dimension_numbers = #tpu.dot_dimension_numbers<[1], [0], [0], [1], [0, 0, 1, 1], [], []>} : vector<1x16xf32>, vector<16x128xf32>, vector<1x128xf32> -> vector<1x128xf32>
    %78 = arith.addf %72, %77 : vector<1x128xf32>
    %c0_69 = arith.constant 0 : index
    %c7 = arith.constant 7 : index
    %c0_70 = arith.constant 0 : index
    %79 = vector.load %arg14[%c0_69, %c7, %c0_70] : memref<1x25x16xf32, #tpu.memory_space<vmem>>, vector<1x1x16xf32>
    %80 = vector.shape_cast %79 : vector<1x1x16xf32> to vector<1x16xf32>
    %c7_71 = arith.constant 7 : index
    %c0_72 = arith.constant 0 : index
    %c0_73 = arith.constant 0 : index
    %81 = vector.load %arg7[%c7_71, %c0_72, %c0_73] : memref<25x16x128xf32, #tpu.memory_space<vmem>>, vector<1x16x128xf32>
    %82 = vector.shape_cast %81 : vector<1x16x128xf32> to vector<16x128xf32>
    %cst_74 = arith.constant dense<0.000000e+00> : vector<1x128xf32>
    %83 = tpu.matmul %80, %82, %cst_74 {dimension_numbers = #tpu.dot_dimension_numbers<[1], [0], [0], [1], [0, 0, 1, 1], [], []>} : vector<1x16xf32>, vector<16x128xf32>, vector<1x128xf32> -> vector<1x128xf32>
    %84 = arith.addf %78, %83 : vector<1x128xf32>
    %c0_75 = arith.constant 0 : index
    %c8 = arith.constant 8 : index
    %c0_76 = arith.constant 0 : index
    %85 = vector.load %arg14[%c0_75, %c8, %c0_76] : memref<1x25x16xf32, #tpu.memory_space<vmem>>, vector<1x1x16xf32>
    %86 = vector.shape_cast %85 : vector<1x1x16xf32> to vector<1x16xf32>
    %c8_77 = arith.constant 8 : index
    %c0_78 = arith.constant 0 : index
    %c0_79 = arith.constant 0 : index
    %87 = vector.load %arg7[%c8_77, %c0_78, %c0_79] : memref<25x16x128xf32, #tpu.memory_space<vmem>>, vector<1x16x128xf32>
    %88 = vector.shape_cast %87 : vector<1x16x128xf32> to vector<16x128xf32>
    %cst_80 = arith.constant dense<0.000000e+00> : vector<1x128xf32>
    %89 = tpu.matmul %86, %88, %cst_80 {dimension_numbers = #tpu.dot_dimension_numbers<[1], [0], [0], [1], [0, 0, 1, 1], [], []>} : vector<1x16xf32>, vector<16x128xf32>, vector<1x128xf32> -> vector<1x128xf32>
    %90 = arith.addf %84, %89 : vector<1x128xf32>
    %c0_81 = arith.constant 0 : index
    %c9 = arith.constant 9 : index
    %c0_82 = arith.constant 0 : index
    %91 = vector.load %arg14[%c0_81, %c9, %c0_82] : memref<1x25x16xf32, #tpu.memory_space<vmem>>, vector<1x1x16xf32>
    %92 = vector.shape_cast %91 : vector<1x1x16xf32> to vector<1x16xf32>
    %c9_83 = arith.constant 9 : index
    %c0_84 = arith.constant 0 : index
    %c0_85 = arith.constant 0 : index
    %93 = vector.load %arg7[%c9_83, %c0_84, %c0_85] : memref<25x16x128xf32, #tpu.memory_space<vmem>>, vector<1x16x128xf32>
    %94 = vector.shape_cast %93 : vector<1x16x128xf32> to vector<16x128xf32>
    %cst_86 = arith.constant dense<0.000000e+00> : vector<1x128xf32>
    %95 = tpu.matmul %92, %94, %cst_86 {dimension_numbers = #tpu.dot_dimension_numbers<[1], [0], [0], [1], [0, 0, 1, 1], [], []>} : vector<1x16xf32>, vector<16x128xf32>, vector<1x128xf32> -> vector<1x128xf32>
    %96 = arith.addf %90, %95 : vector<1x128xf32>
    %c0_87 = arith.constant 0 : index
    %c10 = arith.constant 10 : index
    %c0_88 = arith.constant 0 : index
    %97 = vector.load %arg14[%c0_87, %c10, %c0_88] : memref<1x25x16xf32, #tpu.memory_space<vmem>>, vector<1x1x16xf32>
    %98 = vector.shape_cast %97 : vector<1x1x16xf32> to vector<1x16xf32>
    %c10_89 = arith.constant 10 : index
    %c0_90 = arith.constant 0 : index
    %c0_91 = arith.constant 0 : index
    %99 = vector.load %arg7[%c10_89, %c0_90, %c0_91] : memref<25x16x128xf32, #tpu.memory_space<vmem>>, vector<1x16x128xf32>
    %100 = vector.shape_cast %99 : vector<1x16x128xf32> to vector<16x128xf32>
    %cst_92 = arith.constant dense<0.000000e+00> : vector<1x128xf32>
    %101 = tpu.matmul %98, %100, %cst_92 {dimension_numbers = #tpu.dot_dimension_numbers<[1], [0], [0], [1], [0, 0, 1, 1], [], []>} : vector<1x16xf32>, vector<16x128xf32>, vector<1x128xf32> -> vector<1x128xf32>
    %102 = arith.addf %96, %101 : vector<1x128xf32>
    %c0_93 = arith.constant 0 : index
    %c11 = arith.constant 11 : index
    %c0_94 = arith.constant 0 : index
    %103 = vector.load %arg14[%c0_93, %c11, %c0_94] : memref<1x25x16xf32, #tpu.memory_space<vmem>>, vector<1x1x16xf32>
    %104 = vector.shape_cast %103 : vector<1x1x16xf32> to vector<1x16xf32>
    %c11_95 = arith.constant 11 : index
    %c0_96 = arith.constant 0 : index
    %c0_97 = arith.constant 0 : index
    %105 = vector.load %arg7[%c11_95, %c0_96, %c0_97] : memref<25x16x128xf32, #tpu.memory_space<vmem>>, vector<1x16x128xf32>
    %106 = vector.shape_cast %105 : vector<1x16x128xf32> to vector<16x128xf32>
    %cst_98 = arith.constant dense<0.000000e+00> : vector<1x128xf32>
    %107 = tpu.matmul %104, %106, %cst_98 {dimension_numbers = #tpu.dot_dimension_numbers<[1], [0], [0], [1], [0, 0, 1, 1], [], []>} : vector<1x16xf32>, vector<16x128xf32>, vector<1x128xf32> -> vector<1x128xf32>
    %108 = arith.addf %102, %107 : vector<1x128xf32>
    %c0_99 = arith.constant 0 : index
    %c12 = arith.constant 12 : index
    %c0_100 = arith.constant 0 : index
    %109 = vector.load %arg14[%c0_99, %c12, %c0_100] : memref<1x25x16xf32, #tpu.memory_space<vmem>>, vector<1x1x16xf32>
    %110 = vector.shape_cast %109 : vector<1x1x16xf32> to vector<1x16xf32>
    %c12_101 = arith.constant 12 : index
    %c0_102 = arith.constant 0 : index
    %c0_103 = arith.constant 0 : index
    %111 = vector.load %arg7[%c12_101, %c0_102, %c0_103] : memref<25x16x128xf32, #tpu.memory_space<vmem>>, vector<1x16x128xf32>
    %112 = vector.shape_cast %111 : vector<1x16x128xf32> to vector<16x128xf32>
    %cst_104 = arith.constant dense<0.000000e+00> : vector<1x128xf32>
    %113 = tpu.matmul %110, %112, %cst_104 {dimension_numbers = #tpu.dot_dimension_numbers<[1], [0], [0], [1], [0, 0, 1, 1], [], []>} : vector<1x16xf32>, vector<16x128xf32>, vector<1x128xf32> -> vector<1x128xf32>
    %114 = arith.addf %108, %113 : vector<1x128xf32>
    %c0_105 = arith.constant 0 : index
    %c13 = arith.constant 13 : index
    %c0_106 = arith.constant 0 : index
    %115 = vector.load %arg14[%c0_105, %c13, %c0_106] : memref<1x25x16xf32, #tpu.memory_space<vmem>>, vector<1x1x16xf32>
    %116 = vector.shape_cast %115 : vector<1x1x16xf32> to vector<1x16xf32>
    %c13_107 = arith.constant 13 : index
    %c0_108 = arith.constant 0 : index
    %c0_109 = arith.constant 0 : index
    %117 = vector.load %arg7[%c13_107, %c0_108, %c0_109] : memref<25x16x128xf32, #tpu.memory_space<vmem>>, vector<1x16x128xf32>
    %118 = vector.shape_cast %117 : vector<1x16x128xf32> to vector<16x128xf32>
    %cst_110 = arith.constant dense<0.000000e+00> : vector<1x128xf32>
    %119 = tpu.matmul %116, %118, %cst_110 {dimension_numbers = #tpu.dot_dimension_numbers<[1], [0], [0], [1], [0, 0, 1, 1], [], []>} : vector<1x16xf32>, vector<16x128xf32>, vector<1x128xf32> -> vector<1x128xf32>
    %120 = arith.addf %114, %119 : vector<1x128xf32>
    %c0_111 = arith.constant 0 : index
    %c14 = arith.constant 14 : index
    %c0_112 = arith.constant 0 : index
    %121 = vector.load %arg14[%c0_111, %c14, %c0_112] : memref<1x25x16xf32, #tpu.memory_space<vmem>>, vector<1x1x16xf32>
    %122 = vector.shape_cast %121 : vector<1x1x16xf32> to vector<1x16xf32>
    %c14_113 = arith.constant 14 : index
    %c0_114 = arith.constant 0 : index
    %c0_115 = arith.constant 0 : index
    %123 = vector.load %arg7[%c14_113, %c0_114, %c0_115] : memref<25x16x128xf32, #tpu.memory_space<vmem>>, vector<1x16x128xf32>
    %124 = vector.shape_cast %123 : vector<1x16x128xf32> to vector<16x128xf32>
    %cst_116 = arith.constant dense<0.000000e+00> : vector<1x128xf32>
    %125 = tpu.matmul %122, %124, %cst_116 {dimension_numbers = #tpu.dot_dimension_numbers<[1], [0], [0], [1], [0, 0, 1, 1], [], []>} : vector<1x16xf32>, vector<16x128xf32>, vector<1x128xf32> -> vector<1x128xf32>
    %126 = arith.addf %120, %125 : vector<1x128xf32>
    %c0_117 = arith.constant 0 : index
    %c15 = arith.constant 15 : index
    %c0_118 = arith.constant 0 : index
    %127 = vector.load %arg14[%c0_117, %c15, %c0_118] : memref<1x25x16xf32, #tpu.memory_space<vmem>>, vector<1x1x16xf32>
    %128 = vector.shape_cast %127 : vector<1x1x16xf32> to vector<1x16xf32>
    %c15_119 = arith.constant 15 : index
    %c0_120 = arith.constant 0 : index
    %c0_121 = arith.constant 0 : index
    %129 = vector.load %arg7[%c15_119, %c0_120, %c0_121] : memref<25x16x128xf32, #tpu.memory_space<vmem>>, vector<1x16x128xf32>
    %130 = vector.shape_cast %129 : vector<1x16x128xf32> to vector<16x128xf32>
    %cst_122 = arith.constant dense<0.000000e+00> : vector<1x128xf32>
    %131 = tpu.matmul %128, %130, %cst_122 {dimension_numbers = #tpu.dot_dimension_numbers<[1], [0], [0], [1], [0, 0, 1, 1], [], []>} : vector<1x16xf32>, vector<16x128xf32>, vector<1x128xf32> -> vector<1x128xf32>
    %132 = arith.addf %126, %131 : vector<1x128xf32>
    %c0_123 = arith.constant 0 : index
    %c16 = arith.constant 16 : index
    %c0_124 = arith.constant 0 : index
    %133 = vector.load %arg14[%c0_123, %c16, %c0_124] : memref<1x25x16xf32, #tpu.memory_space<vmem>>, vector<1x1x16xf32>
    %134 = vector.shape_cast %133 : vector<1x1x16xf32> to vector<1x16xf32>
    %c16_125 = arith.constant 16 : index
    %c0_126 = arith.constant 0 : index
    %c0_127 = arith.constant 0 : index
    %135 = vector.load %arg7[%c16_125, %c0_126, %c0_127] : memref<25x16x128xf32, #tpu.memory_space<vmem>>, vector<1x16x128xf32>
    %136 = vector.shape_cast %135 : vector<1x16x128xf32> to vector<16x128xf32>
    %cst_128 = arith.constant dense<0.000000e+00> : vector<1x128xf32>
    %137 = tpu.matmul %134, %136, %cst_128 {dimension_numbers = #tpu.dot_dimension_numbers<[1], [0], [0], [1], [0, 0, 1, 1], [], []>} : vector<1x16xf32>, vector<16x128xf32>, vector<1x128xf32> -> vector<1x128xf32>
    %138 = arith.addf %132, %137 : vector<1x128xf32>
    %c0_129 = arith.constant 0 : index
    %c17 = arith.constant 17 : index
    %c0_130 = arith.constant 0 : index
    %139 = vector.load %arg14[%c0_129, %c17, %c0_130] : memref<1x25x16xf32, #tpu.memory_space<vmem>>, vector<1x1x16xf32>
    %140 = vector.shape_cast %139 : vector<1x1x16xf32> to vector<1x16xf32>
    %c17_131 = arith.constant 17 : index
    %c0_132 = arith.constant 0 : index
    %c0_133 = arith.constant 0 : index
    %141 = vector.load %arg7[%c17_131, %c0_132, %c0_133] : memref<25x16x128xf32, #tpu.memory_space<vmem>>, vector<1x16x128xf32>
    %142 = vector.shape_cast %141 : vector<1x16x128xf32> to vector<16x128xf32>
    %cst_134 = arith.constant dense<0.000000e+00> : vector<1x128xf32>
    %143 = tpu.matmul %140, %142, %cst_134 {dimension_numbers = #tpu.dot_dimension_numbers<[1], [0], [0], [1], [0, 0, 1, 1], [], []>} : vector<1x16xf32>, vector<16x128xf32>, vector<1x128xf32> -> vector<1x128xf32>
    %144 = arith.addf %138, %143 : vector<1x128xf32>
    %c0_135 = arith.constant 0 : index
    %c18 = arith.constant 18 : index
    %c0_136 = arith.constant 0 : index
    %145 = vector.load %arg14[%c0_135, %c18, %c0_136] : memref<1x25x16xf32, #tpu.memory_space<vmem>>, vector<1x1x16xf32>
    %146 = vector.shape_cast %145 : vector<1x1x16xf32> to vector<1x16xf32>
    %c18_137 = arith.constant 18 : index
    %c0_138 = arith.constant 0 : index
    %c0_139 = arith.constant 0 : index
    %147 = vector.load %arg7[%c18_137, %c0_138, %c0_139] : memref<25x16x128xf32, #tpu.memory_space<vmem>>, vector<1x16x128xf32>
    %148 = vector.shape_cast %147 : vector<1x16x128xf32> to vector<16x128xf32>
    %cst_140 = arith.constant dense<0.000000e+00> : vector<1x128xf32>
    %149 = tpu.matmul %146, %148, %cst_140 {dimension_numbers = #tpu.dot_dimension_numbers<[1], [0], [0], [1], [0, 0, 1, 1], [], []>} : vector<1x16xf32>, vector<16x128xf32>, vector<1x128xf32> -> vector<1x128xf32>
    %150 = arith.addf %144, %149 : vector<1x128xf32>
    %c0_141 = arith.constant 0 : index
    %c19 = arith.constant 19 : index
    %c0_142 = arith.constant 0 : index
    %151 = vector.load %arg14[%c0_141, %c19, %c0_142] : memref<1x25x16xf32, #tpu.memory_space<vmem>>, vector<1x1x16xf32>
    %152 = vector.shape_cast %151 : vector<1x1x16xf32> to vector<1x16xf32>
    %c19_143 = arith.constant 19 : index
    %c0_144 = arith.constant 0 : index
    %c0_145 = arith.constant 0 : index
    %153 = vector.load %arg7[%c19_143, %c0_144, %c0_145] : memref<25x16x128xf32, #tpu.memory_space<vmem>>, vector<1x16x128xf32>
    %154 = vector.shape_cast %153 : vector<1x16x128xf32> to vector<16x128xf32>
    %cst_146 = arith.constant dense<0.000000e+00> : vector<1x128xf32>
    %155 = tpu.matmul %152, %154, %cst_146 {dimension_numbers = #tpu.dot_dimension_numbers<[1], [0], [0], [1], [0, 0, 1, 1], [], []>} : vector<1x16xf32>, vector<16x128xf32>, vector<1x128xf32> -> vector<1x128xf32>
    %156 = arith.addf %150, %155 : vector<1x128xf32>
    %c0_147 = arith.constant 0 : index
    %c20 = arith.constant 20 : index
    %c0_148 = arith.constant 0 : index
    %157 = vector.load %arg14[%c0_147, %c20, %c0_148] : memref<1x25x16xf32, #tpu.memory_space<vmem>>, vector<1x1x16xf32>
    %158 = vector.shape_cast %157 : vector<1x1x16xf32> to vector<1x16xf32>
    %c20_149 = arith.constant 20 : index
    %c0_150 = arith.constant 0 : index
    %c0_151 = arith.constant 0 : index
    %159 = vector.load %arg7[%c20_149, %c0_150, %c0_151] : memref<25x16x128xf32, #tpu.memory_space<vmem>>, vector<1x16x128xf32>
    %160 = vector.shape_cast %159 : vector<1x16x128xf32> to vector<16x128xf32>
    %cst_152 = arith.constant dense<0.000000e+00> : vector<1x128xf32>
    %161 = tpu.matmul %158, %160, %cst_152 {dimension_numbers = #tpu.dot_dimension_numbers<[1], [0], [0], [1], [0, 0, 1, 1], [], []>} : vector<1x16xf32>, vector<16x128xf32>, vector<1x128xf32> -> vector<1x128xf32>
    %162 = arith.addf %156, %161 : vector<1x128xf32>
    %c0_153 = arith.constant 0 : index
    %c21 = arith.constant 21 : index
    %c0_154 = arith.constant 0 : index
    %163 = vector.load %arg14[%c0_153, %c21, %c0_154] : memref<1x25x16xf32, #tpu.memory_space<vmem>>, vector<1x1x16xf32>
    %164 = vector.shape_cast %163 : vector<1x1x16xf32> to vector<1x16xf32>
    %c21_155 = arith.constant 21 : index
    %c0_156 = arith.constant 0 : index
    %c0_157 = arith.constant 0 : index
    %165 = vector.load %arg7[%c21_155, %c0_156, %c0_157] : memref<25x16x128xf32, #tpu.memory_space<vmem>>, vector<1x16x128xf32>
    %166 = vector.shape_cast %165 : vector<1x16x128xf32> to vector<16x128xf32>
    %cst_158 = arith.constant dense<0.000000e+00> : vector<1x128xf32>
    %167 = tpu.matmul %164, %166, %cst_158 {dimension_numbers = #tpu.dot_dimension_numbers<[1], [0], [0], [1], [0, 0, 1, 1], [], []>} : vector<1x16xf32>, vector<16x128xf32>, vector<1x128xf32> -> vector<1x128xf32>
    %168 = arith.addf %162, %167 : vector<1x128xf32>
    %c0_159 = arith.constant 0 : index
    %c22 = arith.constant 22 : index
    %c0_160 = arith.constant 0 : index
    %169 = vector.load %arg14[%c0_159, %c22, %c0_160] : memref<1x25x16xf32, #tpu.memory_space<vmem>>, vector<1x1x16xf32>
    %170 = vector.shape_cast %169 : vector<1x1x16xf32> to vector<1x16xf32>
    %c22_161 = arith.constant 22 : index
    %c0_162 = arith.constant 0 : index
    %c0_163 = arith.constant 0 : index
    %171 = vector.load %arg7[%c22_161, %c0_162, %c0_163] : memref<25x16x128xf32, #tpu.memory_space<vmem>>, vector<1x16x128xf32>
    %172 = vector.shape_cast %171 : vector<1x16x128xf32> to vector<16x128xf32>
    %cst_164 = arith.constant dense<0.000000e+00> : vector<1x128xf32>
    %173 = tpu.matmul %170, %172, %cst_164 {dimension_numbers = #tpu.dot_dimension_numbers<[1], [0], [0], [1], [0, 0, 1, 1], [], []>} : vector<1x16xf32>, vector<16x128xf32>, vector<1x128xf32> -> vector<1x128xf32>
    %174 = arith.addf %168, %173 : vector<1x128xf32>
    %c0_165 = arith.constant 0 : index
    %c23 = arith.constant 23 : index
    %c0_166 = arith.constant 0 : index
    %175 = vector.load %arg14[%c0_165, %c23, %c0_166] : memref<1x25x16xf32, #tpu.memory_space<vmem>>, vector<1x1x16xf32>
    %176 = vector.shape_cast %175 : vector<1x1x16xf32> to vector<1x16xf32>
    %c23_167 = arith.constant 23 : index
    %c0_168 = arith.constant 0 : index
    %c0_169 = arith.constant 0 : index
    %177 = vector.load %arg7[%c23_167, %c0_168, %c0_169] : memref<25x16x128xf32, #tpu.memory_space<vmem>>, vector<1x16x128xf32>
    %178 = vector.shape_cast %177 : vector<1x16x128xf32> to vector<16x128xf32>
    %cst_170 = arith.constant dense<0.000000e+00> : vector<1x128xf32>
    %179 = tpu.matmul %176, %178, %cst_170 {dimension_numbers = #tpu.dot_dimension_numbers<[1], [0], [0], [1], [0, 0, 1, 1], [], []>} : vector<1x16xf32>, vector<16x128xf32>, vector<1x128xf32> -> vector<1x128xf32>
    %180 = arith.addf %174, %179 : vector<1x128xf32>
    %c0_171 = arith.constant 0 : index
    %c24 = arith.constant 24 : index
    %c0_172 = arith.constant 0 : index
    %181 = vector.load %arg14[%c0_171, %c24, %c0_172] : memref<1x25x16xf32, #tpu.memory_space<vmem>>, vector<1x1x16xf32>
    %182 = vector.shape_cast %181 : vector<1x1x16xf32> to vector<1x16xf32>
    %c24_173 = arith.constant 24 : index
    %c0_174 = arith.constant 0 : index
    %c0_175 = arith.constant 0 : index
    %183 = vector.load %arg7[%c24_173, %c0_174, %c0_175] : memref<25x16x128xf32, #tpu.memory_space<vmem>>, vector<1x16x128xf32>
    %184 = vector.shape_cast %183 : vector<1x16x128xf32> to vector<16x128xf32>
    %cst_176 = arith.constant dense<0.000000e+00> : vector<1x128xf32>
    %185 = tpu.matmul %182, %184, %cst_176 {dimension_numbers = #tpu.dot_dimension_numbers<[1], [0], [0], [1], [0, 0, 1, 1], [], []>} : vector<1x16xf32>, vector<16x128xf32>, vector<1x128xf32> -> vector<1x128xf32>
    %186 = arith.addf %180, %185 : vector<1x128xf32>
    %c0_177 = arith.constant 0 : index
    %c0_178 = arith.constant 0 : index
    %187 = vector.load %arg8[%c0_177, %c0_178] : memref<1x128xf32, #tpu.memory_space<vmem>>, vector<1x128xf32>
    %188 = arith.addf %186, %187 : vector<1x128xf32>
    %cst_179 = arith.constant 0.000000e+00 : f32
    %189 = vector.broadcast %cst_179 : f32 to vector<1x128xf32>
    %190 = arith.maximumf %188, %189 : vector<1x128xf32>
    %c0_180 = arith.constant 0 : index
    %c0_181 = arith.constant 0 : index
    %191 = vector.load %arg9[%c0_180, %c0_181] : memref<128x128xf32, #tpu.memory_space<vmem>>, vector<128x128xf32>
    %cst_182 = arith.constant dense<0.000000e+00> : vector<1x128xf32>
    %192 = tpu.matmul %190, %191, %cst_182 {dimension_numbers = #tpu.dot_dimension_numbers<[1], [0], [0], [1], [0, 0, 1, 1], [], []>} : vector<1x128xf32>, vector<128x128xf32>, vector<1x128xf32> -> vector<1x128xf32>
    %c0_183 = arith.constant 0 : index
    %c0_184 = arith.constant 0 : index
    %193 = vector.load %arg10[%c0_183, %c0_184] : memref<1x128xf32, #tpu.memory_space<vmem>>, vector<1x128xf32>
    %194 = arith.addf %192, %193 : vector<1x128xf32>
    %cst_185 = arith.constant 0.000000e+00 : f32
    %195 = vector.broadcast %cst_185 : f32 to vector<1x128xf32>
    %196 = arith.maximumf %194, %195 : vector<1x128xf32>
    %c0_186 = arith.constant 0 : index
    %c0_187 = arith.constant 0 : index
    %197 = vector.load %arg11[%c0_186, %c0_187] : memref<128x128xf32, #tpu.memory_space<vmem>>, vector<128x128xf32>
    %cst_188 = arith.constant dense<0.000000e+00> : vector<1x128xf32>
    %198 = tpu.matmul %196, %197, %cst_188 {dimension_numbers = #tpu.dot_dimension_numbers<[1], [0], [0], [1], [0, 0, 1, 1], [], []>} : vector<1x128xf32>, vector<128x128xf32>, vector<1x128xf32> -> vector<1x128xf32>
    %c0_189 = arith.constant 0 : index
    %c0_190 = arith.constant 0 : index
    %199 = vector.load %arg12[%c0_189, %c0_190] : memref<1x128xf32, #tpu.memory_space<vmem>>, vector<1x128xf32>
    %200 = arith.addf %198, %199 : vector<1x128xf32>
    %c0_191 = arith.constant 0 : index
    %c0_192 = arith.constant 0 : index
    %c0_193 = arith.constant 0 : index
    %201 = vector.load %arg13[%c0_191, %c0_192, %c0_193] : memref<1x1x128xf32, #tpu.memory_space<vmem>>, vector<1x1x128xf32>
    %202 = vector.shape_cast %201 : vector<1x1x128xf32> to vector<1x128xf32>
    %203 = vector.shape_cast %200 : vector<1x128xf32> to vector<1x1x128xf32>
    tpu.vector_store %arg13[%c0_191, %c0_192, %c0_193], %203 {strides = array<i32>} : memref<1x1x128xf32, #tpu.memory_space<vmem>>, vector<1x1x128xf32>,
    return
  }
  func.func @transform_0(%arg0: i32) -> (i32, i32, i32) {
    %c0_i32 = arith.constant 0 : i32
    %c0_i32_0 = arith.constant 0 : i32
    %c0_i32_1 = arith.constant 0 : i32
    return %arg0, %c0_i32, %c0_i32_0 : i32, i32, i32
  }
  func.func @transform_1(%arg0: i32) -> (i32, i32, i32) {
    %c0_i32 = arith.constant 0 : i32
    %c0_i32_0 = arith.constant 0 : i32
    %c0_i32_1 = arith.constant 0 : i32
    return %arg0, %c0_i32, %c0_i32_0 : i32, i32, i32
  }
  func.func @transform_2(%arg0: i32) -> (i32, i32, i32) {
    %c0_i32 = arith.constant 0 : i32
    %c0_i32_0 = arith.constant 0 : i32
    %c0_i32_1 = arith.constant 0 : i32
    return %arg0, %c0_i32, %c0_i32_0 : i32, i32, i32
  }
  func.func @transform_3(%arg0: i32) -> (i32, i32, i32) {
    %c0_i32 = arith.constant 0 : i32
    %c0_i32_0 = arith.constant 0 : i32
    %c0_i32_1 = arith.constant 0 : i32
    return %arg0, %c0_i32, %c0_i32_0 : i32, i32, i32
  }
  func.func @transform_4(%arg0: i32) -> (i32, i32) {
    %c0_i32 = arith.constant 0 : i32
    %c0_i32_0 = arith.constant 0 : i32
    %c0_i32_1 = arith.constant 0 : i32
    return %c0_i32, %c0_i32_0 : i32, i32
  }
  func.func @transform_5(%arg0: i32) -> (i32, i32) {
    %c0_i32 = arith.constant 0 : i32
    %c0_i32_0 = arith.constant 0 : i32
    %c0_i32_1 = arith.constant 0 : i32
    return %c0_i32, %c0_i32_0 : i32, i32
  }
  func.func @transform_6(%arg0: i32) -> (i32, i32, i32) {
    %c0_i32 = arith.constant 0 : i32
    %c0_i32_0 = arith.constant 0 : i32
    %c0_i32_1 = arith.constant 0 : i32
    %c0_i32_2 = arith.constant 0 : i32
    return %c0_i32, %c0_i32_0, %c0_i32_1 : i32, i32, i32
  }
  func.func @transform_7(%arg0: i32) -> (i32, i32) {
    %c0_i32 = arith.constant 0 : i32
    %c0_i32_0 = arith.constant 0 : i32
    %c0_i32_1 = arith.constant 0 : i32
    return %c0_i32, %c0_i32_0 : i32, i32
  }
  func.func @transform_8(%arg0: i32) -> (i32, i32) {
    %c0_i32 = arith.constant 0 : i32
    %c0_i32_0 = arith.constant 0 : i32
    %c0_i32_1 = arith.constant 0 : i32
    return %c0_i32, %c0_i32_0 : i32, i32
  }
  func.func @transform_9(%arg0: i32) -> (i32, i32) {
    %c0_i32 = arith.constant 0 : i32
    %c0_i32_0 = arith.constant 0 : i32
    %c0_i32_1 = arith.constant 0 : i32
    return %c0_i32, %c0_i32_0 : i32, i32
  }
  func.func @transform_10(%arg0: i32) -> (i32, i32) {
    %c0_i32 = arith.constant 0 : i32
    %c0_i32_0 = arith.constant 0 : i32
    %c0_i32_1 = arith.constant 0 : i32
    return %c0_i32, %c0_i32_0 : i32, i32
  }
  func.func @transform_11(%arg0: i32) -> (i32, i32) {
    %c0_i32 = arith.constant 0 : i32
    %c0_i32_0 = arith.constant 0 : i32
    %c0_i32_1 = arith.constant 0 : i32
    return %c0_i32, %c0_i32_0 : i32, i32
  }
  func.func @transform_12(%arg0: i32) -> (i32, i32, i32) {
    %c0_i32 = arith.constant 0 : i32
    %c0_i32_0 = arith.constant 0 : i32
    %c0_i32_1 = arith.constant 0 : i32
    return %arg0, %c0_i32, %c0_i32_0 : i32, i32, i32
  }
}

</mosaic_0001>

<bundles_post_ra>
// kernel: net_forward.2
= control target key start
LH: loop header
LB: loop body
LE: loop exit
PB: predicated region body
PF: predicated region fallthrough
CT: control target
= control target key end

     0   :  { %s1404_s21 = smov 0   ;;  %s1689_s0 = inlined_call_operand.vmem [shape: f32[392,75], index: 0, kind: input, shape index: {}]   ;;  %s1690_s1 = inlined_call_operand.vmem [shape: f32[392,75], index: 1, kind: input, shape index: {}]   ;;  %s1691_s2 = inlined_call_operand.vmem [shape: f32[392,75], index: 2, kind: input, shape index: {}]   ;;  %s1692_s3 = inlined_call_operand.vmem [shape: f32[392,75], index: 3, kind: input, shape index: {}]   ;;  %s1693_s4 = inlined_call_operand.vmem [shape: f32[75,8], index: 4, kind: input, shape index: {}]   ;;  %s1694_s5 = inlined_call_operand.vmem [shape: f32[1,8], index: 5, kind: input, shape index: {}]   ;;  %s1695_s6 = inlined_call_operand.vmem [shape: f32[392,8], index: 6, kind: output, shape index: {}]  }
   0x1 LB: > { %s1004_s22 = sadd.s32 4294967295, %s1363_s21   ;;  %p1008_p0 = scmp.ge.s32.totalorder %s1363_s21, 1  ;;  %s1363_s21 = sphi %s1404_s21, %s16_s21  }
   0x2   : > { %p246_p1 = scmp.lt.s32.totalorder %s1363_s21, 8 }
   0x4   : > { %p247_p2 = pnand %p1008_p0, %p246_p1 }
   0x5   : > { %v321_v0 = vld [vmem:[%s1693_s4] sm:$0xff] (!%p247_p2)  ;;  %v322_v1 = vld [vmem:[%s1693_s4 + $0x8] sm:$0xff] (!%p247_p2)  ;;  %v323_v2 = vld [vmem:[%s1693_s4 + $0x10] sm:$0xff] (!%p247_p2)  ;;  %v1365_v3 = vmov (!%p247_p2), 0.0|0.0   ;;  %s291_s7 = smul.u32 (!%p247_p2), 7, %s1004_s22  ;;  %vm1366_vm0 = vmmov (!%p247_p2), 0  }
   0x6   : > { %250 = sbr.rel (%p247_p2) target bundleno = 300 (0x12c), region = 44  ;;  %1281 = vmatprep.subr.bf16.mxu0 (!%p247_p2), %v1365_v3  ;;  %1297 = vmatprep.subr.bf16.mxu1 (!%p247_p2), %v1365_v3  ;;  %v1282_v4 = vpack.c.bf16 (!%p247_p2), %v322_v1, %v321_v0  ;;  %v324_v5 = vld [vmem:[%s1693_s4 + $0x18] sm:$0xff] (!%p247_p2)  ;;  %v1367_v6 = vmov (!%p247_p2), 0.0   ;;  %v325_v8 = vld [vmem:[%s1693_s4 + $0x20] sm:$0xff] (!%p247_p2)  ;;  %v326_v9 = vld [vmem:[%s1693_s4 + $0x28] sm:$0xff] (!%p247_p2)  ;;  %vm367_vm1 = vcmask (!%p247_p2), 1042432  }
   0x7   : > { %1137 = vmatprep.mubr.msk.f32.mxu0 (!%p247_p2), %vm1366_vm0, %v1367_v6  ;;  %1178 = vmatprep.mubr.msk.f32.mxu1 (!%p247_p2), %vm1366_vm0, %v1367_v6  ;;  %v1285_v7 = vpack.c.bf16 (!%p247_p2), %v324_v5, %v323_v2  ;;  %p292_p3 = scmp.lt.s32.totalorder (!%p247_p2), %s291_s7, 48  ;;  %v1288_v10 = vpack.c.bf16 (!%p247_p2), %v326_v9, %v325_v8  ;;  %v327_v11 = vld [vmem:[%s1693_s4 + $0x30] sm:$0xff] (!%p247_p2)  ;;  %v328_v12 = vld [vmem:[%s1693_s4 + $0x38] sm:$0xff] (!%p247_p2)  ;;  %v329_v14 = vld [vmem:[%s1693_s4 + $0x40] sm:$0xff] (!%p247_p2)  ;;  %vm1368_vm2 = vmmov (!%p247_p2), 1   ;;  %vm345_vm4 = vcmask (!%p247_p2), 613376  }
   0x8   : > { %1283 = vmatpush3.bf16.msra.mxu0 (!%p247_p2), %v1282_v4  ;;  %1299 = vmatpush3.bf16.msra.mxu1 (!%p247_p2), %v1282_v4  ;;  %v1291_v13 = vpack.c.bf16 (!%p247_p2), %v328_v12, %v327_v11  ;;  %v330_v15 = vld [vmem:[%s1693_s4 + $0x48] sm:$0x7] (!%p247_p2)  ;;  %vm1458_vm3 = vmpackc.low (!%p247_p2), %vm367_vm1, %vm1368_vm2  ;;  %v1615_v46 = vld [vmem:[%s1694_s5] ss:$0 sm:$0xff] (!%p247_p2)  ;;  %vm904_vm5 = vcmask (!%p247_p2), 64512  }
   0x9   : > { %1284 = vmatprep.subr.bf16.mxu0 (!%p247_p2), %v1365_v3  ;;  %1300 = vmatprep.subr.bf16.mxu1 (!%p247_p2), %v1365_v3  ;;  %v1294_v16 = vpack.c.bf16 (!%p247_p2), %v330_v15, %v329_v14 }
   0xc   : > { %1286 = vmatpush3.bf16.msra.mxu0 (!%p247_p2), %v1285_v7  ;;  %1302 = vmatpush3.bf16.msra.mxu1 (!%p247_p2), %v1285_v7 }
   0xd   : > { %1287 = vmatprep.subr.bf16.mxu0 %v1365_v3  ;;  %1303 = vmatprep.subr.bf16.mxu1 %v1365_v3  ;;  %s1699_s7 = smov (!%p292_p3, %s291_s7), 48 }
   0xe   : > { %s1454_s20 = sshll.u32 %s1699_s7, 3 }
   0xf   : > { %s1466_s24 = scalar_lea.vmem %s1689_s0, %s1454_s20  ;;  %s1472_s27 = scalar_lea.vmem %s1690_s1, %s1454_s20 }
  0x10   : > { %1289 = vmatpush3.bf16.msra.mxu0 %v1288_v10  ;;  %1305 = vmatpush3.bf16.msra.mxu1 %v1288_v10  ;;  %v332_v18 = vld [vmem:[%s1466_s24] sm:$0xff]  ;;  %v333_v20 = vld [vmem:[%s1466_s24 + $0x8] sm:$0xff]  ;;  %v334_v22 = vld [vmem:[%s1466_s24 + $0x10] sm:$0xff]  ;;  %s1546_s30 = scalar_lea.vmem %s1691_s2, %s1454_s20  ;;  %s1552_s9 = scalar_lea.vmem %s1692_s3, %s1454_s20 }
  0x11   : > { %1290 = vmatprep.subr.bf16.mxu0 %v1365_v3  ;;  %1306 = vmatprep.subr.bf16.mxu1 %v1365_v3  ;;  %v478_v19 = vld [vmem:[%s1472_s27] sm:$0xff]  ;;  %v479_v21 = vld [vmem:[%s1472_s27 + $0x8] sm:$0xff]  ;;  %v480_v23 = vld [vmem:[%s1472_s27 + $0x10] sm:$0xff]  ;;  %s1653_s14 = scalar_lea.vmem %s1695_s6, %s1454_s20 }
  0x12   : > { %v335_v24 = vld [vmem:[%s1466_s24 + $0x18] sm:$0xff]  ;;  %v336_v26 = vld [vmem:[%s1466_s24 + $0x20] sm:$0xff]  ;;  %v337_v28 = vld [vmem:[%s1466_s24 + $0x28] sm:$0xff] }
  0x13   : > { %v481_v25 = vld [vmem:[%s1472_s27 + $0x18] sm:$0xff]  ;;  %v482_v27 = vld [vmem:[%s1472_s27 + $0x20] sm:$0xff]  ;;  %v483_v29 = vld [vmem:[%s1472_s27 + $0x28] sm:$0xff] }
  0x14   : > { %1292 = vmatpush3.bf16.msra.mxu0 %v1291_v13  ;;  %1308 = vmatpush3.bf16.msra.mxu1 %v1291_v13  ;;  %v338_v30 = vld [vmem:[%s1466_s24 + $0x30] sm:$0xff]  ;;  %v620_v32 = vld [vmem:[%s1546_s30] sm:$0xff]  ;;  %v621_v34 = vld [vmem:[%s1546_s30 + $0x8] sm:$0xff] }
  0x15   : > { %1293 = vmatprep.subr.bf16.mxu0 %v1365_v3  ;;  %1309 = vmatprep.subr.bf16.mxu1 %v1365_v3  ;;  %v484_v31 = vld [vmem:[%s1472_s27 + $0x30] sm:$0xff]  ;;  %v755_v33 = vld [vmem:[%s1552_s9] sm:$0xff]  ;;  %v756_v35 = vld [vmem:[%s1552_s9 + $0x8] sm:$0xff] }
  0x16   : > { %v622_v36 = vld [vmem:[%s1546_s30 + $0x10] sm:$0xff]  ;;  %v623_v38 = vld [vmem:[%s1546_s30 + $0x18] sm:$0xff]  ;;  %v624_v40 = vld [vmem:[%s1546_s30 + $0x20] sm:$0xff] }
  0x17   : > { %v757_v37 = vld [vmem:[%s1552_s9 + $0x10] sm:$0xff]  ;;  %v758_v39 = vld [vmem:[%s1552_s9 + $0x18] sm:$0xff]  ;;  %v759_v41 = vld [vmem:[%s1552_s9 + $0x20] sm:$0xff] }
  0x18   : > { %1296 = vmatpush3.bf16.msk.msra.mxu0 %vm1458_vm3, %v1294_v16  ;;  %1312 = vmatpush3.bf16.msk.msra.mxu1 %vm1458_vm3, %v1294_v16  ;;  %v625_v42 = vld [vmem:[%s1546_s30 + $0x28] sm:$0xff]  ;;  %v626_v44 = vld [vmem:[%s1546_s30 + $0x30] sm:$0xff] }
  0x19   : > { %1313 = vmatprep.subr.bf16.mxu0 %v1365_v3  ;;  %1329 = vmatprep.subr.bf16.mxu1 %v1365_v3  ;;  %v760_v43 = vld [vmem:[%s1552_s9 + $0x28] sm:$0xff]  ;;  %v761_v45 = vld [vmem:[%s1552_s9 + $0x30] sm:$0xff] }
  0x1b   : > { %1138 = vmatmul.mubr.msk.f32.vlgmr.msra.gmra.mrb[0].mxu0 %vm345_vm4, %v332_v18  ;;  %1179 = vmatmul.mubr.msk.f32.vlgmr.msra.gmra.mrb[0].mxu1 %vm345_vm4, %v478_v19 }
  0x1c   : > { %1315 = vmatpush3.bf16.msra.mxu0 %v1282_v4  ;;  %1331 = vmatpush3.bf16.msra.mxu1 %v1282_v4 }
  0x1d   : > { %1140 = vmatprep.mubr.msk.f32.mxu0 %vm1366_vm0, %v1367_v6  ;;  %1181 = vmatprep.mubr.msk.f32.mxu1 %vm1366_vm0, %v1367_v6 }
  0x1e   : > { %1316 = vmatprep.subr.bf16.mxu0 %v1365_v3  ;;  %1332 = vmatprep.subr.bf16.mxu1 %v1365_v3 }
  0x1f   : > { %1141 = vmatmul.mubr.msk.f32.gmra.mrb[2].mxu0 %vm345_vm4, %v333_v20  ;;  %1182 = vmatmul.mubr.msk.f32.gmra.mrb[2].mxu1 %vm345_vm4, %v479_v21 }
  0x20   : > { %1143 = vmatprep.mubr.msk.f32.mxu0 %vm1366_vm0, %v1367_v6  ;;  %1184 = vmatprep.mubr.msk.f32.mxu1 %vm1366_vm0, %v1367_v6 }
  0x21   : > { %1318 = vmatpush3.bf16.msra.mxu0 %v1285_v7  ;;  %1334 = vmatpush3.bf16.msra.mxu1 %v1285_v7 }
  0x22   : > { %1319 = vmatprep.subr.bf16.mxu0 %v1365_v3  ;;  %1335 = vmatprep.subr.bf16.mxu1 %v1365_v3 }
  0x23   : > { %1144 = vmatmul.mubr.msk.f32.gmra.mrb[4].mxu0 %vm345_vm4, %v334_v22  ;;  %1185 = vmatmul.mubr.msk.f32.gmra.mrb[4].mxu1 %vm345_vm4, %v480_v23 }
  0x24   : > { %1146 = vmatprep.mubr.msk.f32.mxu0 %vm1366_vm0, %v1367_v6  ;;  %1187 = vmatprep.mubr.msk.f32.mxu1 %vm1366_vm0, %v1367_v6 }
  0x25   : > { %1321 = vmatpush3.bf16.msra.mxu0 %v1288_v10  ;;  %1337 = vmatpush3.bf16.msra.mxu1 %v1288_v10 }
  0x26   : > { %1322 = vmatprep.subr.bf16.mxu0 %v1365_v3  ;;  %1338 = vmatprep.subr.bf16.mxu1 %v1365_v3 }
  0x27   : > { %1147 = vmatmul.mubr.msk.f32.gmra.mrb[6].mxu0 %vm345_vm4, %v335_v24  ;;  %1188 = vmatmul.mubr.msk.f32.gmra.mrb[6].mxu1 %vm345_vm4, %v481_v25 }
  0x28   : > { %1149 = vmatprep.mubr.msk.f32.mxu0 %vm1366_vm0, %v1367_v6  ;;  %1190 = vmatprep.mubr.msk.f32.mxu1 %vm1366_vm0, %v1367_v6 }
  0x29   : > { %1324 = vmatpush3.bf16.msra.mxu0 %v1291_v13  ;;  %1340 = vmatpush3.bf16.msra.mxu1 %v1291_v13 }
  0x2a   : > { %1325 = vmatprep.subr.bf16.mxu0 %v1365_v3  ;;  %1341 = vmatprep.subr.bf16.mxu1 %v1365_v3 }
  0x2b   : > { %1150 = vmatmul.mubr.msk.f32.gmra.mrb[8].mxu0 %vm345_vm4, %v336_v26  ;;  %1191 = vmatmul.mubr.msk.f32.gmra.mrb[8].mxu1 %vm345_vm4, %v482_v27 }
  0x2c   : > { %1152 = vmatprep.mubr.msk.f32.mxu0 %vm1366_vm0, %v1367_v6  ;;  %1193 = vmatprep.mubr.msk.f32.mxu1 %vm1366_vm0, %v1367_v6 }
  0x2d   : > { %1328 = vmatpush3.bf16.msk.msra.mxu0 %vm1458_vm3, %v1294_v16  ;;  %1344 = vmatpush3.bf16.msk.msra.mxu1 %vm1458_vm3, %v1294_v16 }
  0x2f   : > { %1153 = vmatmul.mubr.msk.f32.gmra.mrb[10].mxu0 %vm345_vm4, %v337_v28  ;;  %1194 = vmatmul.mubr.msk.f32.gmra.mrb[10].mxu1 %vm345_vm4, %v483_v29 }
  0x30   : > { %1155 = vmatprep.mubr.msk.f32.mxu0 %vm1366_vm0, %v1367_v6  ;;  %1196 = vmatprep.mubr.msk.f32.mxu1 %vm1366_vm0, %v1367_v6 }
  0x33   : > { %1156 = vmatmul.mubr.msk.f32.gmra.mrb[12].mxu0 %vm345_vm4, %v338_v30  ;;  %1197 = vmatmul.mubr.msk.f32.gmra.mrb[12].mxu1 %vm345_vm4, %v484_v31 }
  0x34   : > { %1219 = vmatprep.mubr.msk.f32.mxu0 %vm1366_vm0, %v1367_v6  ;;  %1260 = vmatprep.mubr.msk.f32.mxu1 %vm1366_vm0, %v1367_v6 }
  0x37   : > { %1220 = vmatmul.mubr.msk.f32.vlgmr.msra.gmra.mrb[14].mxu0 %vm345_vm4, %v620_v32  ;;  %1261 = vmatmul.mubr.msk.f32.vlgmr.msra.gmra.mrb[14].mxu1 %vm345_vm4, %v755_v33 }
  0x38   : > { %1222 = vmatprep.mubr.msk.f32.mxu0 %vm1366_vm0, %v1367_v6  ;;  %1263 = vmatprep.mubr.msk.f32.mxu1 %vm1366_vm0, %v1367_v6 }
  0x3b   : > { %1223 = vmatmul.mubr.msk.f32.gmra.mrb[16].mxu0 %vm345_vm4, %v621_v34  ;;  %1264 = vmatmul.mubr.msk.f32.gmra.mrb[16].mxu1 %vm345_vm4, %v756_v35 }
  0x3c   : > { %1225 = vmatprep.mubr.msk.f32.mxu0 %vm1366_vm0, %v1367_v6  ;;  %1266 = vmatprep.mubr.msk.f32.mxu1 %vm1366_vm0, %v1367_v6 }
  0x3f   : > { %1226 = vmatmul.mubr.msk.f32.gmra.mrb[18].mxu0 %vm345_vm4, %v622_v36  ;;  %1267 = vmatmul.mubr.msk.f32.gmra.mrb[18].mxu1 %vm345_vm4, %v757_v37 }
  0x40   : > { %1228 = vmatprep.mubr.msk.f32.mxu0 %vm1366_vm0, %v1367_v6  ;;  %1269 = vmatprep.mubr.msk.f32.mxu1 %vm1366_vm0, %v1367_v6 }
  0x43   : > { %1229 = vmatmul.mubr.msk.f32.gmra.mrb[20].mxu0 %vm345_vm4, %v623_v38  ;;  %1270 = vmatmul.mubr.msk.f32.gmra.mrb[20].mxu1 %vm345_vm4, %v758_v39 }
  0x44   : > { %1231 = vmatprep.mubr.msk.f32.mxu0 %vm1366_vm0, %v1367_v6  ;;  %1272 = vmatprep.mubr.msk.f32.mxu1 %vm1366_vm0, %v1367_v6 }
  0x47   : > { %1232 = vmatmul.mubr.msk.f32.gmra.mrb[22].mxu0 %vm345_vm4, %v624_v40  ;;  %1273 = vmatmul.mubr.msk.f32.gmra.mrb[22].mxu1 %vm345_vm4, %v759_v41 }
  0x48   : > { %1234 = vmatprep.mubr.msk.f32.mxu0 %vm1366_vm0, %v1367_v6  ;;  %1275 = vmatprep.mubr.msk.f32.mxu1 %vm1366_vm0, %v1367_v6 }
  0x4b   : > { %1235 = vmatmul.mubr.msk.f32.gmra.mrb[24].mxu0 %vm345_vm4, %v625_v42  ;;  %1276 = vmatmul.mubr.msk.f32.gmra.mrb[24].mxu1 %vm345_vm4, %v760_v43 }
  0x4c   : > { %1237 = vmatprep.mubr.msk.f32.mxu0 %vm1366_vm0, %v1367_v6  ;;  %1278 = vmatprep.mubr.msk.f32.mxu1 %vm1366_vm0, %v1367_v6 }
  0x4f   : > { %1238 = vmatmul.mubr.msk.f32.gmra.mrb[26].mxu0 %vm345_vm4, %v626_v44  ;;  %1279 = vmatmul.mubr.msk.f32.gmra.mrb[26].mxu1 %vm345_vm4, %v761_v45 }
  0xee   : > { %v437_v47 = vpop.f32.mrb[0].mxu0  ;;  %v572_v48 = vpop.f32.mrb[0].mxu1 }
  0xef   : > { %v438_v49 = vadd.f32 %v1615_v46, %v437_v47  ;;  %v573_v50 = vadd.f32 %v1615_v46, %v572_v48  ;;  %v1139_v51 = vpop.f32.mrb[1].mxu0  ;;  %v1180_v52 = vpop.f32.mrb[1].mxu1 }
  0xf1   : > { %v471_v53 = vmax.f32 %v438_v49, 0.0  ;;  %v606_v54 = vmax.f32 %v573_v50, 0.0 }
  0xf2   : > { %v442_v55 = vpop.f32.mrb[2].mxu0  ;;  %v577_v56 = vpop.f32.mrb[2].mxu1 }
  0xf3   : > { %v1619_v57 = vmax.f32 %v471_v53, %v606_v54  ;;  %v443_v58 = vadd.f32 %v1615_v46, %v442_v55  ;;  %v578_v59 = vadd.f32 %v1615_v46, %v577_v56  ;;  %v1142_v60 = vpop.f32.mrb[3].mxu0  ;;  %v1183_v61 = vpop.f32.mrb[3].mxu1 }
  0xf5   : > { %v472_v62 = vmax.f32 %v443_v58, 0.0  ;;  %v607_v63 = vmax.f32 %v578_v59, 0.0 }
  0xf6   : > { %v447_v0 = vpop.f32.mrb[4].mxu0  ;;  %v582_v1 = vpop.f32.mrb[4].mxu1 }
  0xf7   : > { %v1623_v2 = vmax.f32 %v472_v62, %v607_v63  ;;  %v448_v3 = vadd.f32 %v1615_v46, %v447_v0  ;;  %v583_v4 = vadd.f32 %v1615_v46, %v582_v1  ;;  %v1145_v5 = vpop.f32.mrb[5].mxu0  ;;  %v1186_v6 = vpop.f32.mrb[5].mxu1 }
  0xf9   : > { %v473_v7 = vmax.f32 %v448_v3, 0.0  ;;  %v608_v8 = vmax.f32 %v583_v4, 0.0 }
  0xfa   : > { %v452_v9 = vpop.f32.mrb[6].mxu0  ;;  %v587_v10 = vpop.f32.mrb[6].mxu1 }
  0xfb   : > { %v1627_v11 = vmax.f32 %v473_v7, %v608_v8  ;;  %v453_v12 = vadd.f32 %v1615_v46, %v452_v9  ;;  %v588_v13 = vadd.f32 %v1615_v46, %v587_v10  ;;  %v1148_v14 = vpop.f32.mrb[7].mxu0  ;;  %v1189_v15 = vpop.f32.mrb[7].mxu1 }
  0xfd   : > { %v474_v16 = vmax.f32 %v453_v12, 0.0  ;;  %v609_v17 = vmax.f32 %v588_v13, 0.0 }
  0xfe   : > { %v457_v18 = vpop.f32.mrb[8].mxu0  ;;  %v592_v19 = vpop.f32.mrb[8].mxu1 }
  0xff   : > { %v1631_v20 = vmax.f32 %v474_v16, %v609_v17  ;;  %v458_v21 = vadd.f32 %v1615_v46, %v457_v18  ;;  %v593_v22 = vadd.f32 %v1615_v46, %v592_v19  ;;  %v1151_v23 = vpop.f32.mrb[9].mxu0  ;;  %v1192_v24 = vpop.f32.mrb[9].mxu1 }
 0x101   : > { %v475_v25 = vmax.f32 %v458_v21, 0.0  ;;  %v610_v26 = vmax.f32 %v593_v22, 0.0 }
 0x102   : > { %v462_v27 = vpop.f32.mrb[10].mxu0  ;;  %v597_v28 = vpop.f32.mrb[10].mxu1 }
 0x103   : > { %v1635_v29 = vmax.f32 %v475_v25, %v610_v26  ;;  %v463_v30 = vadd.f32 %v1615_v46, %v462_v27  ;;  %v598_v31 = vadd.f32 %v1615_v46, %v597_v28  ;;  %v1154_v32 = vpop.f32.mrb[11].mxu0  ;;  %v1195_v33 = vpop.f32.mrb[11].mxu1 }
 0x105   : > { %v476_v34 = vmax.f32 %v463_v30, 0.0  ;;  %v611_v35 = vmax.f32 %v598_v31, 0.0 }
 0x106   : > { %v467_v36 = vpop.f32.mrb[12].mxu0  ;;  %v602_v37 = vpop.f32.mrb[12].mxu1 }
 0x107   : > { %v1639_v38 = vmax.f32 %v476_v34, %v611_v35  ;;  %v468_v39 = vadd.f32 %v1615_v46, %v467_v36  ;;  %v603_v40 = vadd.f32 %v1615_v46, %v602_v37  ;;  %v1157_v41 = vpop.f32.mrb[13].mxu0  ;;  %v1198_v42 = vpop.f32.mrb[13].mxu1 }
 0x109   : > { %v477_v43 = vmax.f32 %v468_v39, 0.0  ;;  %v612_v44 = vmax.f32 %v603_v40, 0.0 }
 0x10a   : > { %v714_v45 = vpop.f32.mrb[14].mxu0  ;;  %v849_v47 = vpop.f32.mrb[14].mxu1 }
 0x10b   : > { %v1643_v48 = vmax.f32 %v477_v43, %v612_v44  ;;  %v715_v49 = vadd.f32 %v1615_v46, %v714_v45  ;;  %v850_v50 = vadd.f32 %v1615_v46, %v849_v47  ;;  %v1221_v51 = vpop.f32.mrb[15].mxu0  ;;  %v1262_v52 = vpop.f32.mrb[15].mxu1 }
 0x10d   : > { %v748_v53 = vmax.f32 %v715_v49, 0.0  ;;  %v883_v54 = vmax.f32 %v850_v50, 0.0 }
 0x10e   : > { %v719_v55 = vpop.f32.mrb[16].mxu0  ;;  %v854_v56 = vpop.f32.mrb[16].mxu1 }
 0x10f   : > { %v890_v58 = vmax.f32 %v748_v53, %v883_v54  ;;  %v720_v59 = vadd.f32 %v1615_v46, %v719_v55  ;;  %v855_v60 = vadd.f32 %v1615_v46, %v854_v56  ;;  %v1224_v61 = vpop.f32.mrb[17].mxu0  ;;  %v1265_v62 = vpop.f32.mrb[17].mxu1 }
 0x111   : > { %v897_v63 = vmax.f32 %v1619_v57, %v890_v58  ;;  %v749_v0 = vmax.f32 %v720_v59, 0.0  ;;  %v884_v1 = vmax.f32 %v855_v60, 0.0 }
 0x112   : > { %v724_v3 = vpop.f32.mrb[18].mxu0  ;;  %v859_v4 = vpop.f32.mrb[18].mxu1 }
 0x113   : > { %905 = vst.msk [vmem:[%s1653_s14] sm:$0xff] %vm904_vm5, %v897_v63  ;;  %v891_v5 = vmax.f32 %v749_v0, %v884_v1  ;;  %v725_v6 = vadd.f32 %v1615_v46, %v724_v3  ;;  %v860_v7 = vadd.f32 %v1615_v46, %v859_v4  ;;  %v1227_v8 = vpop.f32.mrb[19].mxu0  ;;  %v1268_v9 = vpop.f32.mrb[19].mxu1 }
 0x115   : > { %v898_v10 = vmax.f32 %v1623_v2, %v891_v5  ;;  %v750_v12 = vmax.f32 %v725_v6, 0.0  ;;  %v885_v13 = vmax.f32 %v860_v7, 0.0 }
 0x116   : > { %v729_v57 = vpop.f32.mrb[20].mxu0  ;;  %v864_v14 = vpop.f32.mrb[20].mxu1 }
 0x117   : > { %906 = vst.msk [vmem:[%s1653_s14 + $0x8] sm:$0xff] %vm904_vm5, %v898_v10  ;;  %v892_v15 = vmax.f32 %v750_v12, %v885_v13  ;;  %v730_v16 = vadd.f32 %v1615_v46, %v729_v57  ;;  %v865_v17 = vadd.f32 %v1615_v46, %v864_v14  ;;  %v1230_v18 = vpop.f32.mrb[21].mxu0  ;;  %v1271_v19 = vpop.f32.mrb[21].mxu1 }
 0x119   : > { %v899_v21 = vmax.f32 %v1627_v11, %v892_v15  ;;  %v751_v22 = vmax.f32 %v730_v16, 0.0  ;;  %v886_v23 = vmax.f32 %v865_v17, 0.0 }
 0x11a   : > { %v734_v2 = vpop.f32.mrb[22].mxu0  ;;  %v869_v24 = vpop.f32.mrb[22].mxu1 }
 0x11b   : > { %907 = vst.msk [vmem:[%s1653_s14 + $0x10] sm:$0xff] %vm904_vm5, %v899_v21  ;;  %v893_v25 = vmax.f32 %v751_v22, %v886_v23  ;;  %v735_v26 = vadd.f32 %v1615_v46, %v734_v2  ;;  %v870_v27 = vadd.f32 %v1615_v46, %v869_v24  ;;  %v1233_v28 = vpop.f32.mrb[23].mxu0  ;;  %v1274_v30 = vpop.f32.mrb[23].mxu1 }
 0x11d   : > { %v900_v31 = vmax.f32 %v1631_v20, %v893_v25  ;;  %v752_v32 = vmax.f32 %v735_v26, 0.0  ;;  %v887_v33 = vmax.f32 %v870_v27, 0.0 }
 0x11e   : > { %v739_v11 = vpop.f32.mrb[24].mxu0  ;;  %v874_v34 = vpop.f32.mrb[24].mxu1 }
 0x11f   : > { %908 = vst.msk [vmem:[%s1653_s14 + $0x18] sm:$0xff] %vm904_vm5, %v900_v31  ;;  %v894_v35 = vmax.f32 %v752_v32, %v887_v33  ;;  %v740_v36 = vadd.f32 %v1615_v46, %v739_v11  ;;  %v875_v37 = vadd.f32 %v1615_v46, %v874_v34  ;;  %v1236_v39 = vpop.f32.mrb[25].mxu0  ;;  %v1277_v40 = vpop.f32.mrb[25].mxu1 }
 0x121   : > { %v901_v41 = vmax.f32 %v1635_v29, %v894_v35  ;;  %v753_v42 = vmax.f32 %v740_v36, 0.0  ;;  %v888_v20 = vmax.f32 %v875_v37, 0.0 }
 0x122   : > { %v744_v43 = vpop.f32.mrb[26].mxu0  ;;  %v879_v44 = vpop.f32.mrb[26].mxu1 }
 0x123   : > { %909 = vst.msk [vmem:[%s1653_s14 + $0x20] sm:$0xff] %vm904_vm5, %v901_v41  ;;  %v895_v45 = vmax.f32 %v753_v42, %v888_v20  ;;  %v745_v47 = vadd.f32 %v1615_v46, %v744_v43  ;;  %v880_v49 = vadd.f32 %v1615_v46, %v879_v44  ;;  %v1239_v50 = vpop.f32.mrb[27].mxu0  ;;  %v1280_v51 = vpop.f32.mrb[27].mxu1 }
 0x125   : > { %v902_v52 = vmax.f32 %v1639_v38, %v895_v45  ;;  %v754_v53 = vmax.f32 %v745_v47, 0.0  ;;  %v889_v54 = vmax.f32 %v880_v49, 0.0 }
 0x127   : > { %910 = vst.msk [vmem:[%s1653_s14 + $0x28] sm:$0xff] %vm904_vm5, %v902_v52  ;;  %v896_v29 = vmax.f32 %v754_v53, %v889_v54 }
 0x129   : > { %v903_v55 = vmax.f32 %v1643_v48, %v896_v29 }
 0x12b   : > { %911 = vst.msk [vmem:[%s1653_s14 + $0x30] sm:$0xff] %vm904_vm5, %v903_v55 }
 0x12c PF: > { %s16_s21 = sadd.s32 1, %s1363_s21  }
 0x12d   : > { %p13_p4 = scmp.ge.s32.totalorder %s16_s21, 9  }
 0x12f   :  { %15 = sbr.rel (!%p13_p4) target bundleno = 1 (0x1), region = 83 }

// kernel: net_forward.3
= control target key start
LH: loop header
LB: loop body
LE: loop exit
PB: predicated region body
PF: predicated region fallthrough
CT: control target
= control target key end

     0   :  { %17 = vsyncpa [#allocation4], 0  ;;  %s4794_s0 = inlined_call_operand.vmem [shape: f32[2,25,150], index: 0, kind: input, shape index: {}]   ;;  %s4795_s1 = inlined_call_operand.vmem [shape: f32[2,25,150], index: 1, kind: input, shape index: {}]   ;;  %s4796_s2 = inlined_call_operand.vmem [shape: f32[2,25,150], index: 2, kind: input, shape index: {}]   ;;  %s4797_s3 = inlined_call_operand.vmem [shape: f32[2,25,150], index: 3, kind: input, shape index: {}]   ;;  %s4798_s4 = inlined_call_operand.vmem [shape: f32[150,16], index: 4, kind: input, shape index: {}]   ;;  %s4799_s5 = inlined_call_operand.vmem [shape: f32[1,16], index: 5, kind: input, shape index: {}]   ;;  %s4800_s6 = inlined_call_operand.vmem [shape: f32[25,16,128], index: 6, kind: input, shape index: {}]   ;;  %s4801_s7 = inlined_call_operand.vmem [shape: f32[1,128], index: 7, kind: input, shape index: {}]   ;;  %s4802_s8 = inlined_call_operand.vmem [shape: f32[128,128], index: 8, kind: input, shape index: {}]   ;;  %s4803_s9 = inlined_call_operand.vmem [shape: f32[1,128], index: 9, kind: input, shape index: {}]   ;;  %s4804_s10 = inlined_call_operand.vmem [shape: f32[128,128], index: 10, kind: input, shape index: {}]   ;;  %s4805_s11 = inlined_call_operand.vmem [shape: f32[1,128], index: 11, kind: input, shape index: {}]   ;;  %s4806_s12 = inlined_call_operand.hbm [shape: f32[2,1,128], index: 12, kind: output, shape index: {}]  }
   0x1   :  { %19 = vsyncpa [#allocation4 + $0x1], 0  ;;  %s4059_s21 = smov 0   ;;  %s4061_s22 = smov 0  }
   0x2   :  { %s4063_s23 = smov 0   ;;  %s4065_s24 = smov 0  }
   0x3 LB: > { %4808 = sst [smem:[#allocation6_spill]] %s3984_s23  ;;  %s4080_s25 = sadd.s32 4294967295, %s3988_s24   ;;  %s3988_s24 = sphi %s4065_s24, %s4816_s24   ;;  %s3984_s23 = sphi %s4063_s23, %s4813_s23   ;;  %s3980_s22 = sphi %s4061_s22, %s4815_s22   ;;  %s3976_s21 = sphi %s4059_s21, %s4814_s21  }
   0x4   : > { %s3186_s26 = sadd.s32 4294967294, %s3988_s24   ;;  %s4084_s27 = sadd.s32 1, %s3988_s24  }
   0x5   : > { %s304_s28 = sadd.s32 1, %s3984_s23  ;;  %s301_s29 = ssub.s32 %s3988_s24, %s4084_s27 }
   0x6   : > { %p314_p0 = scmp.ne.s32.totalorder %s3984_s23, %s3980_s22  ;;  %p302_p1 = scmp.eq.s32.totalorder %s301_s29, 0 }
   0x7   : > { %p315_p2 = scmp.eq.s32.totalorder %s4080_s25, 1  ;;  %p320_p3 = scmp.ne.s32.totalorder %s3980_s22, %s3976_s21 }
   0x8   : > { %p321_p4 = scmp.eq.s32.totalorder %s3186_s26, 1  ;;  %p3189_p7 = scmp.ge.s32.totalorder %s3988_s24, 1 }
   0x9   : > { %s4095_s30 = scalar_select %p302_p1, %s3984_s23, %s304_s28  }
   0xa   : > { %p4097_p5 = por %p315_p2, %p314_p0  ;;  %p4101_p6 = por %p321_p4, %p320_p3 }
   0xb   : > { %4809 = sst [smem:[#allocation7_spill]] %s4095_s30  ;;  %p395_p8 = scmp.lt.s32.totalorder %s3988_s24, 3 }
   0xd   : > { %p396_p9 = pnand %p3189_p7, %p395_p8 }
   0xe   : > { %v471_v0 = vld [vmem:[%s4798_s4] sm:$0xff] (!%p396_p9)  ;;  %v472_v1 = vld [vmem:[%s4798_s4 + $0x8] sm:$0xff] (!%p396_p9)  ;;  %v473_v2 = vld [vmem:[%s4798_s4 + $0x10] sm:$0xff] (!%p396_p9)  ;;  %v3990_v3 = vmov (!%p396_p9), 0.0|0.0   ;;  %p451_p10 = scmp.lt.s32.totalorder (!%p396_p9), %s4080_s25, 1  ;;  %vm505_vm0 = vcmask (!%p396_p9), 179200  }
   0xf   : > { %399 = sbr.rel (%p396_p9) target bundleno = 1031 (0x407), region = 68  ;;  %3653 = vmatprep.subr.bf16.mxu0 (!%p396_p9), %v3990_v3  ;;  %3680 = vmatprep.subr.bf16.mxu1 (!%p396_p9), %v3990_v3  ;;  %v4118_v4 = vpack.c.bf16 (!%p396_p9), %v472_v1, %v471_v0  ;;  %v474_v5 = vld [vmem:[%s4798_s4 + $0x18] sm:$0xff] (!%p396_p9)  ;;  %v475_v7 = vld [vmem:[%s4798_s4 + $0x20] sm:$0xff] (!%p396_p9)  ;;  %v476_v8 = vld [vmem:[%s4798_s4 + $0x28] sm:$0xff] (!%p396_p9)  ;;  %v3991_v30 = vmov (!%p396_p9), 0.0   ;;  %vm518_vm1 = vcmask (!%p396_p9), 1045504  }
  0x10   : > { %v4126_v6 = vpack.c.bf16 (!%p396_p9), %v474_v5, %v473_v2  ;;  %v4153_v9 = vpack.c.bf16 (!%p396_p9), %v476_v8, %v475_v7  ;;  %v477_v12 = vld [vmem:[%s4798_s4 + $0x30] sm:$0xff] (!%p396_p9)  ;;  %v478_v13 = vld [vmem:[%s4798_s4 + $0x38] sm:$0xff] (!%p396_p9)  ;;  %v479_v15 = vld [vmem:[%s4798_s4 + $0x40] sm:$0xff] (!%p396_p9)  ;;  %vm3992_vm2 = vmmov (!%p396_p9), 0   ;;  %vm950_vm3 = vcmask (!%p396_p9), 130048   ;;  %s449_s23 = sand.u32 (!%p396_p9), 1, %s3980_s22  }
  0x11   : > { %3655 = vmatpush1.bf16.msra.mxu0 (!%p396_p9), %v4118_v4  ;;  %3682 = vmatpush1.bf16.msra.mxu1 (!%p396_p9), %v4118_v4  ;;  %v4169_v14 = vpack.c.bf16 (!%p396_p9), %v478_v13, %v477_v12  ;;  %v480_v16 = vld [vmem:[%s4798_s4 + $0x48] sm:$0xff] (!%p396_p9)  ;;  %v481_v18 = vld [vmem:[%s4798_s4 + $0x50] sm:$0xff] (!%p396_p9)  ;;  %v482_v19 = vld [vmem:[%s4798_s4 + $0x58] sm:$0xff] (!%p396_p9)  ;;  %vm954_vm4 = vcmask (!%p396_p9), 122880   ;;  %s450_s20 = scalar_lea.vmem (!%p396_p9), [#allocation3], %s449_s23 }
  0x12   : > { %3656 = vmatprep.subr.bf16.mxu0 (!%p396_p9), %v3990_v3  ;;  %3683 = vmatprep.subr.bf16.mxu1 (!%p396_p9), %v3990_v3  ;;  %v4181_v17 = vpack.c.bf16 (!%p396_p9), %v480_v16, %v479_v15  ;;  %v4193_v20 = vpack.c.bf16 (!%p396_p9), %v482_v19, %v481_v18  ;;  %v483_v21 = vld [vmem:[%s4798_s4 + $0x60] sm:$0xff] (!%p396_p9)  ;;  %v484_v22 = vld [vmem:[%s4798_s4 + $0x68] sm:$0xff] (!%p396_p9)  ;;  %v485_v24 = vld [vmem:[%s4798_s4 + $0x70] sm:$0xff] (!%p396_p9) }
  0x13   : > { %v4205_v23 = vpack.c.bf16 (!%p396_p9), %v484_v22, %v483_v21  ;;  %v486_v25 = vld [vmem:[%s4798_s4 + $0x78] sm:$0xff] (!%p396_p9)  ;;  %v487_v27 = vld [vmem:[%s4798_s4 + $0x80] sm:$0xff] (!%p396_p9)  ;;  %v488_v28 = vld [vmem:[%s4798_s4 + $0x88] sm:$0xff] (!%p396_p9) }
  0x14   : > { %v4217_v26 = vpack.c.bf16 (!%p396_p9), %v486_v25, %v485_v24  ;;  %v4229_v29 = vpack.c.bf16 (!%p396_p9), %v488_v28, %v487_v27  ;;  %v4240_v31 = vld [vmem:[%s4798_s4 + $0x90] sm:$0x3f] (!%p396_p9)  ;;  %v3220_v63 = vld [vmem:[%s4800_s6 + $0x18] sm:$0xff] (!%p396_p9)  ;;  %v957_v0 = vld [vmem:[%s4800_s6] sm:$0xff] (!%p396_p9) }
  0x15   : > { %3658 = vmatpush1.bf16.msra.mxu0 (!%p396_p9), %v4126_v6  ;;  %3685 = vmatpush1.bf16.msra.mxu1 (!%p396_p9), %v4126_v6  ;;  %v3219_v62 = vld [vmem:[%s4800_s6 + $0x10] sm:$0xff] (!%p396_p9)  ;;  %v958_v2 = vld [vmem:[%s4800_s6 + $0x8] sm:$0xff] (!%p396_p9)  ;;  %v4367_v5 = vld [vmem:[%s4799_s5] ss:$0 sm:$0xff] (!%p396_p9) }
  0x16   : > { %s452_s29 = scalar_select %p451_p10, %s4080_s25, 1  ;;  %3659 = vmatprep.subr.bf16.mxu0 %v3990_v3  ;;  %3686 = vmatprep.subr.bf16.mxu1 %v3990_v3  ;;  %v3762_v1 = vpack.c.bf16 %v3220_v63, %v3219_v62 }
  0x18   : > { %s4137_s19 = sshll.u32 %s452_s29, 6  ;;  %s3083_s29 = scalar_lea.sflag [#allocation4], %s449_s23 }
  0x19   : > { %s4143_s28 = scalar_lea.vmem %s4794_s0, %s4137_s19  ;;  %s4149_s15 = scalar_lea.vmem %s4795_s1, %s4137_s19  ;;  %3661 = vmatpush1.bf16.msra.mxu0 %v4153_v9  ;;  %3688 = vmatpush1.bf16.msra.mxu1 %v4153_v9 }
  0x1a   : > { %v492_v10 = vld [vmem:[%s4143_s28 + $0x8] sm:$0xff]  ;;  %3662 = vmatprep.subr.bf16.mxu0 %v3990_v3  ;;  %3689 = vmatprep.subr.bf16.mxu1 %v3990_v3  ;;  %v491_v32 = vld [vmem:[%s4143_s28] sm:$0xff]  ;;  %v494_v34 = vld [vmem:[%s4143_s28 + $0x18] sm:$0xff]  ;;  %s4280_s17 = scalar_lea.vmem %s4796_s2, %s4137_s19  ;;  %s4286_s26 = scalar_lea.vmem %s4797_s3, %s4137_s19 }
  0x1b   : > { %v612_v11 = vld [vmem:[%s4149_s15 + $0x8] sm:$0xff]  ;;  %3200 = vmatprep.mubr.msk.f32.mxu0 %vm505_vm0, %v492_v10  ;;  %v611_v33 = vld [vmem:[%s4149_s15] sm:$0xff]  ;;  %v614_v35 = vld [vmem:[%s4149_s15 + $0x18] sm:$0xff] }
  0x1c   : > { %3205 = vmatprep.mubr.msk.f32.mxu1 %vm505_vm0, %v612_v11  ;;  %v493_v36 = vld [vmem:[%s4143_s28 + $0x10] sm:$0xff]  ;;  %v496_v38 = vld [vmem:[%s4143_s28 + $0x28] sm:$0xff]  ;;  %v495_v40 = vld [vmem:[%s4143_s28 + $0x20] sm:$0xff] }
  0x1d   : > { %3664 = vmatpush1.bf16.msra.mxu0 %v4169_v14  ;;  %3691 = vmatpush1.bf16.msra.mxu1 %v4169_v14  ;;  %v613_v37 = vld [vmem:[%s4149_s15 + $0x10] sm:$0xff]  ;;  %v616_v39 = vld [vmem:[%s4149_s15 + $0x28] sm:$0xff]  ;;  %v615_v41 = vld [vmem:[%s4149_s15 + $0x20] sm:$0xff] }
  0x1e   : > { %3665 = vmatprep.subr.bf16.mxu0 %v3990_v3  ;;  %3692 = vmatprep.subr.bf16.mxu1 %v3990_v3  ;;  %v498_v42 = vld [vmem:[%s4143_s28 + $0x38] sm:$0x1]  ;;  %v497_v44 = vld [vmem:[%s4143_s28 + $0x30] sm:$0x1]  ;;  %v725_v46 = vld [vmem:[%s4280_s17 + $0x8] sm:$0xff] }
  0x1f   : > { %v618_v43 = vld [vmem:[%s4149_s15 + $0x38] sm:$0x1]  ;;  %v617_v45 = vld [vmem:[%s4149_s15 + $0x30] sm:$0x1]  ;;  %v834_v47 = vld [vmem:[%s4286_s26 + $0x8] sm:$0xff] }
  0x20   : > { %v724_v48 = vld [vmem:[%s4280_s17] sm:$0xff]  ;;  %v727_v50 = vld [vmem:[%s4280_s17 + $0x18] sm:$0xff]  ;;  %v726_v52 = vld [vmem:[%s4280_s17 + $0x10] sm:$0xff] }
  0x21   : > { %3667 = vmatpush1.bf16.msra.mxu0 %v4181_v17  ;;  %3694 = vmatpush1.bf16.msra.mxu1 %v4181_v17  ;;  %v833_v49 = vld [vmem:[%s4286_s26] sm:$0xff]  ;;  %v836_v51 = vld [vmem:[%s4286_s26 + $0x18] sm:$0xff]  ;;  %v835_v53 = vld [vmem:[%s4286_s26 + $0x10] sm:$0xff] }
  0x22   : > { %3668 = vmatprep.subr.bf16.mxu0 %v3990_v3  ;;  %3695 = vmatprep.subr.bf16.mxu1 %v3990_v3  ;;  %v729_v54 = vld [vmem:[%s4280_s17 + $0x28] sm:$0xff]  ;;  %v728_v56 = vld [vmem:[%s4280_s17 + $0x20] sm:$0xff]  ;;  %v731_v58 = vld [vmem:[%s4280_s17 + $0x38] sm:$0x1] }
  0x23   : > { %v838_v55 = vld [vmem:[%s4286_s26 + $0x28] sm:$0xff]  ;;  %v837_v57 = vld [vmem:[%s4286_s26 + $0x20] sm:$0xff]  ;;  %v840_v59 = vld [vmem:[%s4286_s26 + $0x38] sm:$0x1] }
  0x24   : > { %v730_v60 = vld [vmem:[%s4280_s17 + $0x30] sm:$0x1]  ;;  %s3292_s17 = sshll.u32 %s4080_s25, 4  ;;  %s3993_s25 = smov [#allocation3]  }
  0x25   : > { %3670 = vmatpush1.bf16.msra.mxu0 %v4193_v20  ;;  %3697 = vmatpush1.bf16.msra.mxu1 %v4193_v20  ;;  %v839_v61 = vld [vmem:[%s4286_s26 + $0x30] sm:$0x1]  ;;  %s3095_s26 = sshll.u32 %s450_s20, 4  ;;  %s4752_s15 = scalar_lea.hbm %s4806_s12, %s3292_s17  ;;  %s4754_s26 = int_to_ptr.vmem [resolvable:$true] %s3095_s26 }
  0x26   : > { %3671 = vmatprep.subr.bf16.mxu0 %v3990_v3  ;;  %3698 = vmatprep.subr.bf16.mxu1 %v3990_v3  ;;  %s3926_s16 = scalar_lea.vmem %s4754_s26, 16  ;;  %s3930_s30 = sshll.u32 %s3993_s25, 4  ;;  %s3931_s30 = int_to_ptr.vmem [resolvable:$false] %s3930_s30 }
  0x27   : > { %p3927_p11 = scmp.ne.s32.totalorder %s4754_s26, %s3926_s16  ;;  %s3932_s18 = scalar_lea.vmem %s3931_s30, 32 }
  0x28   : > { %p3933_p0 = scmp.lt.s32.totalorder %s4754_s26, %s3931_s30  ;;  %p3934_p1 = scmp.lt.s32.totalorder %s3932_s18, %s3926_s16 }
  0x29   : > { %3673 = vmatpush1.bf16.msra.mxu0 %v4205_v23  ;;  %3700 = vmatpush1.bf16.msra.mxu1 %v4205_v23  ;;  %p3928_p12 = pnand %p3927_p11, %p4097_p5 }
  0x2a   : > { %3674 = vmatprep.subr.bf16.mxu0 %v3990_v3  ;;  %3701 = vmatprep.subr.bf16.mxu1 %v3990_v3  ;;  %p3935_p2 = por %p3934_p1, %p3933_p0 }
  0x2b   : > { %p3929_p13 = pneg %p3928_p12 }
  0x2d   : > { %3676 = vmatpush1.bf16.msra.mxu0 %v4217_v26  ;;  %3703 = vmatpush1.bf16.msra.mxu1 %v4217_v26  ;;  %p3936_p3 = pnand %p3935_p2, %p3929_p13 }
  0x2e   : > { %3677 = vmatprep.subr.bf16.mxu0 %v3990_v3  ;;  %3704 = vmatprep.subr.bf16.mxu1 %v3990_v3 }
  0x31   : > { %3679 = vmatpush1.bf16.msra.mxu0 %v4229_v29  ;;  %3706 = vmatpush1.bf16.msra.mxu1 %v4229_v29 }
  0x32   : > { %558 = vmatprep.subr.mxu0 %v3991_v30  ;;  %667 = vmatprep.subr.mxu1 %v3991_v30 }
  0x35   : > { %3199 = vmatpush1.msk.msra.mxu0 %vm518_vm1, %v4240_v31  ;;  %3204 = vmatpush1.msk.msra.mxu1 %vm518_vm1, %v4240_v31 }
  0x36   : > { %587 = vmatmul.mubr.f32.vlgmr.msra.gmra.mrb[0].mxu0 %v491_v32  ;;  %696 = vmatmul.mubr.f32.vlgmr.msra.gmra.mrb[0].mxu1 %v611_v33 }
  0x37   : > { %3707 = vmatprep.subr.bf16.mxu0 %v3990_v3  ;;  %3734 = vmatprep.subr.bf16.mxu1 %v3990_v3 }
  0x38   : > { %3709 = vmatpush1.bf16.msra.mxu0 %v4118_v4  ;;  %3736 = vmatpush1.bf16.msra.mxu1 %v4118_v4  ;;  %v3765_v4 = vpack.c.bf16 %v958_v2, %v957_v0 }
  0x39   : > { %3710 = vmatprep.subr.bf16.mxu0 %v3990_v3  ;;  %3737 = vmatprep.subr.bf16.mxu1 %v3990_v3 }
  0x3a   : > { %3201 = vmatprep.mubr.msk.f32.mxu0 %vm505_vm0, %v494_v34  ;;  %3206 = vmatprep.mubr.msk.f32.mxu1 %vm505_vm0, %v614_v35 }
  0x3b   : > { %592 = vmatmul.mubr.f32.gmra.mrb[2].mxu0 %v493_v36  ;;  %701 = vmatmul.mubr.f32.gmra.mrb[2].mxu1 %v613_v37 }
  0x3c   : > { %3712 = vmatpush1.bf16.msra.mxu0 %v4126_v6  ;;  %3739 = vmatpush1.bf16.msra.mxu1 %v4126_v6 }
  0x3d   : > { %3713 = vmatprep.subr.bf16.mxu0 %v3990_v3  ;;  %3740 = vmatprep.subr.bf16.mxu1 %v3990_v3 }
  0x3e   : > { %3202 = vmatprep.mubr.msk.f32.mxu0 %vm505_vm0, %v496_v38  ;;  %3207 = vmatprep.mubr.msk.f32.mxu1 %vm505_vm0, %v616_v39 }
  0x3f   : > { %597 = vmatmul.mubr.f32.gmra.mrb[4].mxu0 %v495_v40  ;;  %706 = vmatmul.mubr.f32.gmra.mrb[4].mxu1 %v615_v41 }
  0x40   : > { %3715 = vmatpush1.bf16.msra.mxu0 %v4153_v9  ;;  %3742 = vmatpush1.bf16.msra.mxu1 %v4153_v9 }
  0x41   : > { %3716 = vmatprep.subr.bf16.mxu0 %v3990_v3  ;;  %3743 = vmatprep.subr.bf16.mxu1 %v3990_v3 }
  0x42   : > { %3203 = vmatprep.mubr.msk.f32.mxu0 %vm505_vm0, %v498_v42  ;;  %3208 = vmatprep.mubr.msk.f32.mxu1 %vm505_vm0, %v618_v43 }
  0x43   : > { %602 = vmatmul.mubr.f32.gmra.mrb[6].mxu0 %v497_v44  ;;  %711 = vmatmul.mubr.f32.gmra.mrb[6].mxu1 %v617_v45 }
  0x44   : > { %3718 = vmatpush1.bf16.msra.mxu0 %v4169_v14  ;;  %3745 = vmatpush1.bf16.msra.mxu1 %v4169_v14 }
  0x45   : > { %3719 = vmatprep.subr.bf16.mxu0 %v3990_v3  ;;  %3746 = vmatprep.subr.bf16.mxu1 %v3990_v3 }
  0x46   : > { %3210 = vmatprep.mubr.msk.f32.mxu0 %vm505_vm0, %v725_v46  ;;  %3215 = vmatprep.mubr.msk.f32.mxu1 %vm505_vm0, %v834_v47 }
  0x48   : > { %3721 = vmatpush1.bf16.msra.mxu0 %v4181_v17  ;;  %3748 = vmatpush1.bf16.msra.mxu1 %v4181_v17 }
  0x49   : > { %3722 = vmatprep.subr.bf16.mxu0 %v3990_v3  ;;  %3749 = vmatprep.subr.bf16.mxu1 %v3990_v3 }
  0x4c   : > { %3724 = vmatpush1.bf16.msra.mxu0 %v4193_v20  ;;  %3751 = vmatpush1.bf16.msra.mxu1 %v4193_v20 }
  0x4d   : > { %3725 = vmatprep.subr.bf16.mxu0 %v3990_v3  ;;  %3752 = vmatprep.subr.bf16.mxu1 %v3990_v3 }
  0x50   : > { %3727 = vmatpush1.bf16.msra.mxu0 %v4205_v23  ;;  %3754 = vmatpush1.bf16.msra.mxu1 %v4205_v23 }
  0x51   : > { %3728 = vmatprep.subr.bf16.mxu0 %v3990_v3  ;;  %3755 = vmatprep.subr.bf16.mxu1 %v3990_v3 }
  0x54   : > { %3730 = vmatpush1.bf16.msra.mxu0 %v4217_v26  ;;  %3757 = vmatpush1.bf16.msra.mxu1 %v4217_v26 }
  0x55   : > { %3731 = vmatprep.subr.bf16.mxu0 %v3990_v3  ;;  %3758 = vmatprep.subr.bf16.mxu1 %v3990_v3 }
  0x58   : > { %3733 = vmatpush1.bf16.msra.mxu0 %v4229_v29  ;;  %3760 = vmatpush1.bf16.msra.mxu1 %v4229_v29 }
  0x59   : > { %780 = vmatprep.subr.mxu0 %v3991_v30  ;;  %889 = vmatprep.subr.mxu1 %v3991_v30 }
  0x5c   : > { %3209 = vmatpush1.msk.msra.mxu0 %vm518_vm1, %v4240_v31  ;;  %3214 = vmatpush1.msk.msra.mxu1 %vm518_vm1, %v4240_v31 }
  0x5d   : > { %809 = vmatmul.mubr.f32.vlgmr.msra.gmra.mrb[8].mxu0 %v724_v48  ;;  %918 = vmatmul.mubr.f32.vlgmr.msra.gmra.mrb[8].mxu1 %v833_v49 }
  0x5e   : > { %3211 = vmatprep.mubr.msk.f32.mxu0 %vm505_vm0, %v727_v50  ;;  %3216 = vmatprep.mubr.msk.f32.mxu1 %vm505_vm0, %v836_v51 }
  0x5f   : > { %3761 = vmatprep.subr.bf16.mxu0 %v3990_v3  ;;  %3764 = vmatprep.subr.bf16.mxu1 %v3990_v3 }
  0x60   : > { %3763 = vmatpush3.bf16.msra.mxu0 %v3762_v1  ;;  %3766 = vmatpush3.bf16.msra.mxu1 %v3765_v4 }
  0x61   : > { %814 = vmatmul.mubr.f32.gmra.mrb[10].mxu0 %v726_v52  ;;  %923 = vmatmul.mubr.f32.gmra.mrb[10].mxu1 %v835_v53 }
  0x62   : > { %3212 = vmatprep.mubr.msk.f32.mxu0 %vm505_vm0, %v729_v54  ;;  %3217 = vmatprep.mubr.msk.f32.mxu1 %vm505_vm0, %v838_v55 }
  0x63   : > { %3767 = vmatprep.subr.bf16.mxu0 %v3990_v3  ;;  %3770 = vmatprep.subr.bf16.mxu1 %v3990_v3 }
  0x65   : > { %819 = vmatmul.mubr.f32.gmra.mrb[12].mxu0 %v728_v56  ;;  %928 = vmatmul.mubr.f32.gmra.mrb[12].mxu1 %v837_v57 }
  0x66   : > { %3213 = vmatprep.mubr.msk.f32.mxu0 %vm505_vm0, %v731_v58  ;;  %3218 = vmatprep.mubr.msk.f32.mxu1 %vm505_vm0, %v840_v59 }
  0x69   : > { %824 = vmatmul.mubr.f32.gmra.mrb[14].mxu0 %v730_v60  ;;  %933 = vmatmul.mubr.f32.gmra.mrb[14].mxu1 %v839_v61 }
  0x6a   : > { %3412 = vmatprep.mubr.msk.f32.mxu0 %vm3992_vm2, %v3991_v30  ;;  %3419 = vmatprep.mubr.msk.f32.mxu1 %vm3992_vm2, %v3991_v30 }
 0x109   : > { %v588_v6 = vpop.f32.mrb[0].mxu0  ;;  %v697_v7 = vpop.f32.mrb[0].mxu1 }
 0x10a   : > { %v589_v8 = vadd.f32 %v4367_v5, %v588_v6  ;;  %v698_v9 = vadd.f32 %v4367_v5, %v697_v7  ;;  %v590_v10 = vpop.f32.mrb[1].mxu0  ;;  %v699_v11 = vpop.f32.mrb[1].mxu1  ;;  %v3223_v6 = vld [vmem:[%s4800_s6 + $0x20] sm:$0xff] }
 0x10b   : > { %v3224_v10 = vld [vmem:[%s4800_s6 + $0x28] sm:$0xff]  ;;  %v3226_v11 = vld [vmem:[%s4800_s6 + $0x30] sm:$0xff] }
 0x10c   : > { %v607_v12 = vmax.f32 %v589_v8, 0.0  ;;  %v716_v13 = vmax.f32 %v698_v9, 0.0 }
 0x10e   : > { %v720_v14 = vmax.f32 %v607_v12, %v716_v13  ;;  %v593_v15 = vpop.f32.mrb[2].mxu0  ;;  %v702_v16 = vpop.f32.mrb[2].mxu1  ;;  %v3227_v12 = vld [vmem:[%s4800_s6 + $0x38] sm:$0xff] }
 0x10f   : > { %v594_v17 = vadd.f32 %v4367_v5, %v593_v15  ;;  %v703_v18 = vadd.f32 %v4367_v5, %v702_v16  ;;  %v595_v19 = vpop.f32.mrb[3].mxu0  ;;  %v704_v20 = vpop.f32.mrb[3].mxu1 }
 0x110   : > { %v3768_v20 = vpack.c.bf16 %v3224_v10, %v3223_v6  ;;  %v3260_v6 = vld [vmem:[%s4800_s6 + $0xe8] sm:$0xff] }
 0x111   : > { %v608_v21 = vmax.f32 %v594_v17, 0.0  ;;  %v717_v22 = vmax.f32 %v703_v18, 0.0 }
 0x112   : > { %v598_v23 = vpop.f32.mrb[4].mxu0  ;;  %v707_v24 = vpop.f32.mrb[4].mxu1 }
 0x113   : > { %v721_v25 = vmax.f32 %v608_v21, %v717_v22  ;;  %v599_v26 = vadd.f32 %v4367_v5, %v598_v23  ;;  %v708_v27 = vadd.f32 %v4367_v5, %v707_v24  ;;  %v600_v28 = vpop.f32.mrb[5].mxu0  ;;  %v709_v29 = vpop.f32.mrb[5].mxu1  ;;  %v3771_v21 = vpack.c.bf16 %v3227_v12, %v3226_v11  ;;  %v3229_v22 = vld [vmem:[%s4800_s6 + $0x40] sm:$0xff] }
 0x115   : > { %v609_v31 = vmax.f32 %v599_v26, 0.0  ;;  %v718_v32 = vmax.f32 %v708_v27, 0.0  ;;  %v3230_v26 = vld [vmem:[%s4800_s6 + $0x48] sm:$0xff]  ;;  %v3232_v27 = vld [vmem:[%s4800_s6 + $0x50] sm:$0xff] }
 0x116   : > { %v603_v33 = vpop.f32.mrb[6].mxu0  ;;  %v712_v34 = vpop.f32.mrb[6].mxu1 }
 0x117   : > { %v722_v35 = vmax.f32 %v609_v31, %v718_v32  ;;  %v604_v36 = vadd.f32 %v4367_v5, %v603_v33  ;;  %v713_v37 = vadd.f32 %v4367_v5, %v712_v34  ;;  %v605_v38 = vpop.f32.mrb[7].mxu0  ;;  %v714_v39 = vpop.f32.mrb[7].mxu1  ;;  %v3774_v32 = vpack.c.bf16 %v3230_v26, %v3229_v22  ;;  %v3235_v34 = vld [vmem:[%s4800_s6 + $0x60] sm:$0xff]  ;;  %v3272_v22 = vld [vmem:[%s4800_s6 + $0x128] sm:$0xff] }
 0x118   : > { %v3239_v38 = vld [vmem:[%s4800_s6 + $0x78] sm:$0xff] }
 0x119   : > { %v610_v40 = vmax.f32 %v604_v36, 0.0  ;;  %v719_v41 = vmax.f32 %v713_v37, 0.0  ;;  %v3236_v36 = vld [vmem:[%s4800_s6 + $0x68] sm:$0xff]  ;;  %v3238_v37 = vld [vmem:[%s4800_s6 + $0x70] sm:$0xff] }
 0x11b   : > { %v4377_v42 = vmax.f32 %v610_v40, %v719_v41  ;;  %v3780_v41 = vpack.c.bf16 %v3236_v36, %v3235_v34 }
 0x130   : > { %v810_v43 = vpop.f32.mrb[8].mxu0  ;;  %v919_v44 = vpop.f32.mrb[8].mxu1 }
 0x131   : > { %v811_v45 = vadd.f32 %v4367_v5, %v810_v43  ;;  %v920_v46 = vadd.f32 %v4367_v5, %v919_v44  ;;  %v812_v47 = vpop.f32.mrb[9].mxu0  ;;  %v921_v48 = vpop.f32.mrb[9].mxu1  ;;  %v3241_v43 = vld [vmem:[%s4800_s6 + $0x80] sm:$0xff]  ;;  %v3242_v44 = vld [vmem:[%s4800_s6 + $0x88] sm:$0xff] }
 0x133   : > { %v829_v49 = vmax.f32 %v811_v45, 0.0  ;;  %v938_v50 = vmax.f32 %v920_v46, 0.0  ;;  %v3244_v45 = vld [vmem:[%s4800_s6 + $0x90] sm:$0xff]  ;;  %v3245_v46 = vld [vmem:[%s4800_s6 + $0x98] sm:$0xff] }
 0x134   : > { %v815_v51 = vpop.f32.mrb[10].mxu0  ;;  %v924_v52 = vpop.f32.mrb[10].mxu1 }
 0x135   : > { %v942_v53 = vmax.f32 %v829_v49, %v938_v50  ;;  %v816_v54 = vadd.f32 %v4367_v5, %v815_v51  ;;  %v925_v55 = vadd.f32 %v4367_v5, %v924_v52  ;;  %v817_v56 = vpop.f32.mrb[11].mxu0  ;;  %v926_v57 = vpop.f32.mrb[11].mxu1  ;;  %v3786_v49 = vpack.c.bf16 %v3242_v44, %v3241_v43  ;;  %v3247_v51 = vld [vmem:[%s4800_s6 + $0xa0] sm:$0xff]  ;;  %v3248_v52 = vld [vmem:[%s4800_s6 + $0xa8] sm:$0xff] }
 0x136   : > { %v3789_v50 = vpack.c.bf16 %v3245_v46, %v3244_v45  ;;  %v3792_v57 = vpack.c.bf16 %v3248_v52, %v3247_v51  ;;  %v3289_v45 = vld [vmem:[%s4800_s6 + $0x180] sm:$0xff]  ;;  %v3290_v46 = vld [vmem:[%s4800_s6 + $0x188] sm:$0xff] }
 0x137   : > { %v946_v58 = vmax.f32 %v720_v14, %v942_v53  ;;  %v830_v59 = vmax.f32 %v816_v54, 0.0  ;;  %v939_v60 = vmax.f32 %v925_v55, 0.0  ;;  %v3250_v53 = vld [vmem:[%s4800_s6 + $0xb0] sm:$0xff]  ;;  %v3251_v54 = vld [vmem:[%s4800_s6 + $0xb8] sm:$0xff] }
 0x138   : > { %v820_v61 = vpop.f32.mrb[12].mxu0  ;;  %v929_v62 = vpop.f32.mrb[12].mxu1 }
 0x139   : > { %951 = vst.msk [vmem:[#allocation2] sm:$0xff] %vm950_vm3, %v946_v58  ;;  %v943_v63 = vmax.f32 %v830_v59, %v939_v60  ;;  %v821_v0 = vadd.f32 %v4367_v5, %v820_v61  ;;  %v930_v1 = vadd.f32 %v4367_v5, %v929_v62  ;;  %v822_v2 = vpop.f32.mrb[13].mxu0  ;;  %v931_v4 = vpop.f32.mrb[13].mxu1  ;;  %v3795_v58 = vpack.c.bf16 %v3251_v54, %v3250_v53  ;;  %v3253_v59 = vld [vmem:[%s4800_s6 + $0xc0] sm:$0xff]  ;;  %v3254_v60 = vld [vmem:[%s4800_s6 + $0xc8] sm:$0xff]  ;;  %v3256_v61 = vld [vmem:[%s4800_s6 + $0xd0] sm:$0xff] }
 0x13a   : > { %v3257_v62 = vld [vmem:[%s4800_s6 + $0xd8] sm:$0xff]  ;;  %v3259_v4 = vld [vmem:[%s4800_s6 + $0xe0] sm:$0xff]  ;;  %v2907_v54 = vld [vmem:[%s4802_s8 + $0x8] sm:$0xff] }
 0x13b   : > { %v947_v7 = vmax.f32 %v721_v25, %v943_v63  ;;  %v831_v8 = vmax.f32 %v821_v0, 0.0  ;;  %v940_v9 = vmax.f32 %v930_v1, 0.0  ;;  %v3798_v1 = vpack.c.bf16 %v3254_v60, %v3253_v59  ;;  %v2906_v53 = vld [vmem:[%s4802_s8] sm:$0xff]  ;;  %v2911_v59 = vld [vmem:[%s4802_s8 + $0x28] sm:$0xff] }
 0x13c   : > { %v825_v13 = vpop.f32.mrb[14].mxu0  ;;  %v934_v14 = vpop.f32.mrb[14].mxu1  ;;  %v3801_v2 = vpack.c.bf16 %v3257_v62, %v3256_v61  ;;  %v3804_v11 = vpack.c.bf16 %v3260_v6, %v3259_v4  ;;  %v2912_v61 = vld [vmem:[%s4802_s8 + $0x30] sm:$0xff]  ;;  %v2913_v62 = vld [vmem:[%s4802_s8 + $0x38] sm:$0xff] }
 0x13d   : > { %952 = vst.msk [vmem:[#allocation2 + $0x8] sm:$0xff] %vm950_vm3, %v947_v7  ;;  %v944_v15 = vmax.f32 %v831_v8, %v940_v9  ;;  %v826_v16 = vadd.f32 %v4367_v5, %v825_v13  ;;  %v935_v17 = vadd.f32 %v4367_v5, %v934_v14  ;;  %v827_v18 = vpop.f32.mrb[15].mxu0  ;;  %v936_v19 = vpop.f32.mrb[15].mxu1  ;;  %v3233_v5 = vld [vmem:[%s4800_s6 + $0x58] sm:$0xff]  ;;  %v3262_v7 = vld [vmem:[%s4800_s6 + $0xf0] sm:$0xff]  ;;  %v3265_v13 = vld [vmem:[%s4800_s6 + $0x100] sm:$0xff] }
 0x13e   : > { %v3777_v33 = vpack.c.bf16 %v3233_v5, %v3232_v27  ;;  %v3263_v8 = vld [vmem:[%s4800_s6 + $0xf8] sm:$0xff]  ;;  %v3266_v14 = vld [vmem:[%s4800_s6 + $0x108] sm:$0xff]  ;;  %v2916_v4 = vld [vmem:[%s4802_s8 + $0x50] sm:$0xff] }
 0x13f   : > { %v948_v23 = vmax.f32 %v722_v35, %v944_v15  ;;  %v832_v24 = vmax.f32 %v826_v16, 0.0  ;;  %v941_v25 = vmax.f32 %v935_v17, 0.0  ;;  %v3807_v12 = vpack.c.bf16 %v3263_v8, %v3262_v7  ;;  %v3268_v15 = vld [vmem:[%s4800_s6 + $0x110] sm:$0xff]  ;;  %v3269_v16 = vld [vmem:[%s4800_s6 + $0x118] sm:$0xff]  ;;  %v2918_v8 = vld [vmem:[%s4802_s8 + $0x60] sm:$0xff] }
 0x140   : > { %v959_v28 = vld [vmem:[#allocation2 + $0x1] sm:$0x1]  ;;  %v956_v29 = vld [vmem:[#allocation2] sm:$0x1]  ;;  %v1109_v39 = vld [vmem:[#allocation2 + $0x2] sm:$0x1]  ;;  %v3810_v19 = vpack.c.bf16 %v3266_v14, %v3265_v13 }
 0x141   : > { %953 = vst.msk [vmem:[#allocation2 + $0x10] sm:$0xff] %vm950_vm3, %v948_v23  ;;  %v945_v31 = vmax.f32 %v832_v24, %v941_v25  ;;  %3413 = vmatmul.mubr.msk.f32.vlgmr.msra.gmra.mrb[16].mxu0 %vm950_vm3, %v959_v28  ;;  %3420 = vmatmul.mubr.msk.f32.vlgmr.msra.gmra.mrb[16].mxu1 %vm950_vm3, %v956_v29  ;;  %v1187_v40 = vld [vmem:[#allocation2 + $0x3] sm:$0x1]  ;;  %v1265_v47 = vld [vmem:[#allocation2 + $0x4] sm:$0x1]  ;;  %v3274_v23 = vld [vmem:[%s4800_s6 + $0x130] sm:$0xff] }
 0x142   : > { %3769 = vmatpush3.bf16.msra.mxu0 %v3768_v20  ;;  %3772 = vmatpush3.bf16.msra.mxu1 %v3771_v21  ;;  %v1343_v48 = vld [vmem:[#allocation2 + $0x5] sm:$0x1]  ;;  %v1421_v55 = vld [vmem:[#allocation2 + $0x6] sm:$0x1]  ;;  %v1499_v56 = vld [vmem:[#allocation2 + $0x7] sm:$0x1]  ;;  %v3813_v20 = vpack.c.bf16 %v3269_v16, %v3268_v15 }
 0x143   : > { %v949_v35 = vmax.f32 %v4377_v42, %v945_v31  ;;  %3426 = vmatprep.mubr.msk.f32.mxu0 %vm3992_vm2, %v3991_v30  ;;  %3433 = vmatprep.mubr.msk.f32.mxu1 %vm3992_vm2, %v3991_v30  ;;  %v3783_v42 = vpack.c.bf16 %v3239_v38, %v3238_v37  ;;  %v3271_v21 = vld [vmem:[%s4800_s6 + $0x120] sm:$0xff]  ;;  %v3275_v24 = vld [vmem:[%s4800_s6 + $0x138] sm:$0xff]  ;;  %v3278_v29 = vld [vmem:[%s4800_s6 + $0x148] sm:$0xff] }
 0x144   : > { %3773 = vmatprep.subr.bf16.mxu0 %v3990_v3  ;;  %3776 = vmatprep.subr.bf16.mxu1 %v3990_v3  ;;  %v1577_v63 = vld [vmem:[#allocation2 + $0x8] sm:$0x1]  ;;  %v1655_v0 = vld [vmem:[#allocation2 + $0x9] sm:$0x1]  ;;  %v1733_v9 = vld [vmem:[#allocation2 + $0xa] sm:$0x1]  ;;  %v3816_v27 = vpack.c.bf16 %v3272_v22, %v3271_v21  ;;  %v3819_v5 = vpack.c.bf16 %v3275_v24, %v3274_v23 }
 0x145   : > { %955 = vst.msk [vmem:[#allocation2 + $0x18] sm:$0x1] %vm954_vm4, %v949_v35  ;;  %3427 = vmatmul.mubr.msk.f32.vlgmr.msra.gmra.mrb[18].mxu0 %vm950_vm3, %v1109_v39  ;;  %3434 = vmatmul.mubr.msk.f32.vlgmr.msra.gmra.mrb[18].mxu1 %vm950_vm3, %v1187_v40  ;;  %v1811_v10 = vld [vmem:[#allocation2 + $0xb] sm:$0x1]  ;;  %v1889_v17 = vld [vmem:[#allocation2 + $0xc] sm:$0x1] }
 0x146   : > { %3775 = vmatpush3.bf16.msra.mxu0 %v3774_v32  ;;  %3778 = vmatpush3.bf16.msra.mxu1 %v3777_v33  ;;  %v1967_v18 = vld [vmem:[#allocation2 + $0xd] sm:$0x1]  ;;  %v2045_v25 = vld [vmem:[#allocation2 + $0xe] sm:$0x1]  ;;  %v2123_v26 = vld [vmem:[#allocation2 + $0xf] sm:$0x1] }
 0x147   : > { %3440 = vmatprep.mubr.msk.f32.mxu0 %vm3992_vm2, %v3991_v30  ;;  %3447 = vmatprep.mubr.msk.f32.mxu1 %vm3992_vm2, %v3991_v30  ;;  %v3277_v28 = vld [vmem:[%s4800_s6 + $0x140] sm:$0xff]  ;;  %v3280_v31 = vld [vmem:[%s4800_s6 + $0x150] sm:$0xff]  ;;  %v3281_v32 = vld [vmem:[%s4800_s6 + $0x158] sm:$0xff] }
 0x148   : > { %3779 = vmatprep.subr.bf16.mxu0 %v3990_v3  ;;  %3782 = vmatprep.subr.bf16.mxu1 %v3990_v3  ;;  %v2201_v33 = vld [vmem:[#allocation2 + $0x10] sm:$0x1]  ;;  %v2279_v34 = vld [vmem:[#allocation2 + $0x11] sm:$0x1]  ;;  %v3822_v35 = vpack.c.bf16 %v3278_v29, %v3277_v28  ;;  %v3825_v36 = vpack.c.bf16 %v3281_v32, %v3280_v31  ;;  %v3283_v37 = vld [vmem:[%s4800_s6 + $0x160] sm:$0xff] }
 0x149   : > { %3441 = vmatmul.mubr.msk.f32.vlgmr.msra.gmra.mrb[20].mxu0 %vm950_vm3, %v1265_v47  ;;  %3448 = vmatmul.mubr.msk.f32.vlgmr.msra.gmra.mrb[20].mxu1 %vm950_vm3, %v1343_v48  ;;  %v3284_v38 = vld [vmem:[%s4800_s6 + $0x168] sm:$0xff]  ;;  %v3286_v39 = vld [vmem:[%s4800_s6 + $0x170] sm:$0xff]  ;;  %v3287_v40 = vld [vmem:[%s4800_s6 + $0x178] sm:$0xff] }
 0x14a   : > { %3781 = vmatpush3.bf16.msra.mxu0 %v3780_v41  ;;  %3784 = vmatpush3.bf16.msra.mxu1 %v3783_v42  ;;  %v2357_v41 = vld [vmem:[#allocation2 + $0x12] sm:$0x1]  ;;  %v2435_v42 = vld [vmem:[#allocation2 + $0x13] sm:$0x1]  ;;  %v3828_v43 = vpack.c.bf16 %v3284_v38, %v3283_v37  ;;  %v3831_v44 = vpack.c.bf16 %v3287_v40, %v3286_v39  ;;  %v2513_v47 = vld [vmem:[#allocation2 + $0x14] sm:$0x1] }
 0x14b   : > { %3454 = vmatprep.mubr.msk.f32.mxu0 %vm3992_vm2, %v3991_v30  ;;  %3461 = vmatprep.mubr.msk.f32.mxu1 %vm3992_vm2, %v3991_v30  ;;  %v2591_v48 = vld [vmem:[#allocation2 + $0x15] sm:$0x1]  ;;  %v2747_v51 = vld [vmem:[#allocation2 + $0x17] sm:$0x1]  ;;  %v2917_v6 = vld [vmem:[%s4802_s8 + $0x58] sm:$0xff] }
 0x14c   : > { %3785 = vmatprep.subr.bf16.mxu0 %v3990_v3  ;;  %3788 = vmatprep.subr.bf16.mxu1 %v3990_v3  ;;  %v2825_v52 = vld [vmem:[#allocation2 + $0x18] sm:$0x1]  ;;  %v3852_v7 = vpack.c.bf16 %v2917_v6, %v2916_v4  ;;  %v2994_v14 = vld [vmem:[%s4804_s10] sm:$0xff]  ;;  %v2995_v15 = vld [vmem:[%s4804_s10 + $0x8] sm:$0xff] }
 0x14d   : > { %3455 = vmatmul.mubr.msk.f32.vlgmr.msra.gmra.mrb[22].mxu0 %vm950_vm3, %v1421_v55  ;;  %3462 = vmatmul.mubr.msk.f32.vlgmr.msra.gmra.mrb[22].mxu1 %vm950_vm3, %v1499_v56  ;;  %v3837_v55 = vpack.c.bf16 %v2907_v54, %v2906_v53  ;;  %v2908_v56 = vld [vmem:[%s4802_s8 + $0x10] sm:$0xff]  ;;  %v2999_v21 = vld [vmem:[%s4804_s10 + $0x28] sm:$0xff]  ;;  %v3001_v24 = vld [vmem:[%s4804_s10 + $0x38] sm:$0xff] }
 0x14e   : > { %3787 = vmatpush3.bf16.msra.mxu0 %v3786_v49  ;;  %3790 = vmatpush3.bf16.msra.mxu1 %v3789_v50  ;;  %v3834_v49 = vpack.c.bf16 %v3290_v46, %v3289_v45  ;;  %v2669_v50 = vld [vmem:[#allocation2 + $0x16] sm:$0x1]  ;;  %v3005_v29 = vld [vmem:[%s4804_s10 + $0x58] sm:$0xff]  ;;  %v3006_v32 = vld [vmem:[%s4804_s10 + $0x60] sm:$0xff] }
 0x14f   : > { %3468 = vmatprep.mubr.msk.f32.mxu0 %vm3992_vm2, %v3991_v30  ;;  %3475 = vmatprep.mubr.msk.f32.mxu1 %vm3992_vm2, %v3991_v30  ;;  %v2996_v16 = vld [vmem:[%s4804_s10 + $0x10] sm:$0xff] }
 0x150   : > { %3791 = vmatprep.subr.bf16.mxu0 %v3990_v3  ;;  %3794 = vmatprep.subr.bf16.mxu1 %v3990_v3  ;;  %v3000_v23 = vld [vmem:[%s4804_s10 + $0x30] sm:$0xff] }
 0x151   : > { %3469 = vmatmul.mubr.msk.f32.vlgmr.msra.gmra.mrb[24].mxu0 %vm950_vm3, %v1577_v63  ;;  %3476 = vmatmul.mubr.msk.f32.vlgmr.msra.gmra.mrb[24].mxu1 %vm950_vm3, %v1655_v0  ;;  %v3846_v63 = vpack.c.bf16 %v2913_v62, %v2912_v61  ;;  %v2914_v0 = vld [vmem:[%s4802_s8 + $0x40] sm:$0xff]  ;;  %v3004_v28 = vld [vmem:[%s4804_s10 + $0x50] sm:$0xff] }
 0x152   : > { %3793 = vmatpush3.bf16.msra.mxu0 %v3792_v57  ;;  %3796 = vmatpush3.bf16.msra.mxu1 %v3795_v58  ;;  %v2910_v58 = vld [vmem:[%s4802_s8 + $0x20] sm:$0xff]  ;;  %v3876_v31 = vpack.c.bf16 %v3005_v29, %v3004_v28 }
 0x153   : > { %3482 = vmatprep.mubr.msk.f32.mxu0 %vm3992_vm2, %v3991_v30  ;;  %3489 = vmatprep.mubr.msk.f32.mxu1 %vm3992_vm2, %v3991_v30  ;;  %v3843_v60 = vpack.c.bf16 %v2911_v59, %v2910_v58 }
 0x154   : > { %3797 = vmatprep.subr.bf16.mxu0 %v3990_v3  ;;  %3800 = vmatprep.subr.bf16.mxu1 %v3990_v3 }
 0x155   : > { %3483 = vmatmul.mubr.msk.f32.vlgmr.msra.gmra.mrb[26].mxu0 %vm950_vm3, %v1733_v9  ;;  %3490 = vmatmul.mubr.msk.f32.vlgmr.msra.gmra.mrb[26].mxu1 %vm950_vm3, %v1811_v10  ;;  %v2919_v9 = vld [vmem:[%s4802_s8 + $0x68] sm:$0xff] }
 0x156   : > { %3799 = vmatpush3.bf16.msra.mxu0 %v3798_v1  ;;  %3802 = vmatpush3.bf16.msra.mxu1 %v3801_v2  ;;  %v2915_v1 = vld [vmem:[%s4802_s8 + $0x48] sm:$0xff]  ;;  %v3855_v10 = vpack.c.bf16 %v2919_v9, %v2918_v8 }
 0x157   : > { %3496 = vmatprep.mubr.msk.f32.mxu0 %vm3992_vm2, %v3991_v30  ;;  %3503 = vmatprep.mubr.msk.f32.mxu1 %vm3992_vm2, %v3991_v30  ;;  %v3849_v2 = vpack.c.bf16 %v2915_v1, %v2914_v0 }
 0x158   : > { %3803 = vmatprep.subr.bf16.mxu0 %v3990_v3  ;;  %3806 = vmatprep.subr.bf16.mxu1 %v3990_v3 }
 0x159   : > { %3497 = vmatmul.mubr.msk.f32.vlgmr.msra.gmra.mrb[28].mxu0 %vm950_vm3, %v1889_v17  ;;  %3504 = vmatmul.mubr.msk.f32.vlgmr.msra.gmra.mrb[28].mxu1 %vm950_vm3, %v1967_v18  ;;  %v3861_v17 = vpack.c.bf16 %v2995_v15, %v2994_v14  ;;  %v2997_v18 = vld [vmem:[%s4804_s10 + $0x18] sm:$0xff] }
 0x15a   : > { %3805 = vmatpush3.bf16.msra.mxu0 %v3804_v11  ;;  %3808 = vmatpush3.bf16.msra.mxu1 %v3807_v12  ;;  %v2920_v11 = vld [vmem:[%s4802_s8 + $0x70] sm:$0xff]  ;;  %v2921_v12 = vld [vmem:[%s4802_s8 + $0x78] sm:$0xff] }
 0x15b   : > { %3510 = vmatprep.mubr.msk.f32.mxu0 %vm3992_vm2, %v3991_v30  ;;  %3517 = vmatprep.mubr.msk.f32.mxu1 %vm3992_vm2, %v3991_v30  ;;  %v3858_v13 = vpack.c.bf16 %v2921_v12, %v2920_v11 }
 0x15c   : > { %3809 = vmatprep.subr.bf16.mxu0 %v3990_v3  ;;  %3812 = vmatprep.subr.bf16.mxu1 %v3990_v3 }
 0x15d   : > { %3511 = vmatmul.mubr.msk.f32.vlgmr.msra.gmra.mrb[30].mxu0 %vm950_vm3, %v2045_v25  ;;  %3518 = vmatmul.mubr.msk.f32.vlgmr.msra.gmra.mrb[30].mxu1 %vm950_vm3, %v2123_v26  ;;  %v3870_v25 = vpack.c.bf16 %v3001_v24, %v3000_v23  ;;  %v3002_v26 = vld [vmem:[%s4804_s10 + $0x40] sm:$0xff] }
 0x15e   : > { %3811 = vmatpush3.bf16.msra.mxu0 %v3810_v19  ;;  %3814 = vmatpush3.bf16.msra.mxu1 %v3813_v20  ;;  %v3864_v19 = vpack.c.bf16 %v2997_v18, %v2996_v16  ;;  %v2998_v20 = vld [vmem:[%s4804_s10 + $0x20] sm:$0xff] }
 0x15f   : > { %3524 = vmatprep.mubr.msk.f32.mxu0 %vm3992_vm2, %v3991_v30  ;;  %3531 = vmatprep.mubr.msk.f32.mxu1 %vm3992_vm2, %v3991_v30  ;;  %v3867_v22 = vpack.c.bf16 %v2999_v21, %v2998_v20 }
 0x160   : > { %3815 = vmatprep.subr.bf16.mxu0 %v3990_v3  ;;  %3818 = vmatprep.subr.bf16.mxu1 %v3990_v3 }
 0x161   : > { %3525 = vmatmul.mubr.msk.f32.vlgmr.msra.gmra.mrb[32].mxu0 %vm950_vm3, %v2201_v33  ;;  %3532 = vmatmul.mubr.msk.f32.vlgmr.msra.gmra.mrb[32].mxu1 %vm950_vm3, %v2279_v34  ;;  %v3007_v33 = vld [vmem:[%s4804_s10 + $0x68] sm:$0xff] }
 0x162   : > { %3817 = vmatpush3.bf16.msra.mxu0 %v3816_v27  ;;  %3820 = vmatpush3.bf16.msra.mxu1 %v3819_v5  ;;  %v3003_v27 = vld [vmem:[%s4804_s10 + $0x48] sm:$0xff]  ;;  %v3879_v34 = vpack.c.bf16 %v3007_v33, %v3006_v32 }
 0x163   : > { %3538 = vmatprep.mubr.msk.f32.mxu0 %vm3992_vm2, %v3991_v30  ;;  %3545 = vmatprep.mubr.msk.f32.mxu1 %vm3992_vm2, %v3991_v30  ;;  %v3873_v5 = vpack.c.bf16 %v3003_v27, %v3002_v26 }
 0x164   : > { %3821 = vmatprep.subr.bf16.mxu0 %v3990_v3  ;;  %3824 = vmatprep.subr.bf16.mxu1 %v3990_v3 }
 0x165   : > { %3539 = vmatmul.mubr.msk.f32.vlgmr.msra.gmra.mrb[34].mxu0 %vm950_vm3, %v2357_v41  ;;  %3546 = vmatmul.mubr.msk.f32.vlgmr.msra.gmra.mrb[34].mxu1 %vm950_vm3, %v2435_v42 }
 0x166   : > { %3823 = vmatpush3.bf16.msra.mxu0 %v3822_v35  ;;  %3826 = vmatpush3.bf16.msra.mxu1 %v3825_v36 }
 0x167   : > { %3552 = vmatprep.mubr.msk.f32.mxu0 %vm3992_vm2, %v3991_v30  ;;  %3559 = vmatprep.mubr.msk.f32.mxu1 %vm3992_vm2, %v3991_v30 }
 0x168   : > { %3827 = vmatprep.subr.bf16.mxu0 %v3990_v3  ;;  %3830 = vmatprep.subr.bf16.mxu1 %v3990_v3 }
 0x169   : > { %3553 = vmatmul.mubr.msk.f32.vlgmr.msra.gmra.mrb[36].mxu0 %vm950_vm3, %v2513_v47  ;;  %3560 = vmatmul.mubr.msk.f32.vlgmr.msra.gmra.mrb[36].mxu1 %vm950_vm3, %v2591_v48 }
 0x16a   : > { %3829 = vmatpush3.bf16.msra.mxu0 %v3828_v43  ;;  %3832 = vmatpush3.bf16.msra.mxu1 %v3831_v44 }
 0x16b   : > { %3566 = vmatprep.mubr.msk.f32.mxu0 %vm3992_vm2, %v3991_v30  ;;  %3573 = vmatprep.mubr.msk.f32.mxu1 %vm3992_vm2, %v3991_v30 }
 0x16c   : > { %3833 = vmatprep.subr.bf16.mxu0 %v3990_v3  ;;  %3836 = vmatprep.subr.bf16.mxu1 %v3990_v3 }
 0x16d   : > { %3567 = vmatmul.mubr.msk.f32.vlgmr.msra.gmra.mrb[38].mxu0 %vm950_vm3, %v2669_v50  ;;  %3574 = vmatmul.mubr.msk.f32.vlgmr.msra.gmra.mrb[38].mxu1 %vm950_vm3, %v2747_v51 }
 0x16e   : > { %3835 = vmatpush3.bf16.msra.mxu0 %v3834_v49  ;;  %3580 = vmatprep.mubr.msk.f32.mxu0 %vm3992_vm2, %v3991_v30 }
 0x16f   : > { %3615 = vmatprep.mubr.msk.f32.mxu1 %vm3992_vm2, %v3991_v30  ;;  %3860 = vmatprep.subr.bf16.mxu0 %v3990_v3 }
 0x170   : > { %3838 = vmatpush3.bf16.msra.mxu1 %v3837_v55 }
 0x171   : > { %3581 = vmatmul.mubr.msk.f32.vlgmr.msra.gmra.mrb[40].mxu0 %vm950_vm3, %v2825_v52  ;;  %3839 = vmatprep.subr.bf16.mxu1 %v3990_v3 }
 0x172   : > { %3650 = vmatprep.mubr.msk.f32.mxu0 %vm3992_vm2, %v3991_v30  ;;  %v2909_v30 = vld [vmem:[%s4802_s8 + $0x18] sm:$0xff]  ;;  %3862 = vmatpush3.bf16.msra.mxu0 %v3861_v17 }
 0x173   : > { %v3840_v57 = vpack.c.bf16 %v2909_v30, %v2908_v56  ;;  %3863 = vmatprep.subr.bf16.mxu0 %v3990_v3 }
 0x175   : > { %3841 = vmatpush3.bf16.msra.mxu1 %v3840_v57 }
 0x176   : > { %3842 = vmatprep.subr.bf16.mxu1 %v3990_v3  ;;  %3865 = vmatpush3.bf16.msra.mxu0 %v3864_v19 }
 0x177   : > { %3866 = vmatprep.subr.bf16.mxu0 %v3990_v3 }
 0x179   : > { %3844 = vmatpush3.bf16.msra.mxu1 %v3843_v60 }
 0x17a   : > { %3845 = vmatprep.subr.bf16.mxu1 %v3990_v3  ;;  %3868 = vmatpush3.bf16.msra.mxu0 %v3867_v22 }
 0x17b   : > { %3869 = vmatprep.subr.bf16.mxu0 %v3990_v3 }
 0x17d   : > { %3847 = vmatpush3.bf16.msra.mxu1 %v3846_v63 }
 0x17e   : > { %3848 = vmatprep.subr.bf16.mxu1 %v3990_v3  ;;  %3871 = vmatpush3.bf16.msra.mxu0 %v3870_v25 }
 0x17f   : > { %3872 = vmatprep.subr.bf16.mxu0 %v3990_v3 }
 0x181   : > { %3850 = vmatpush3.bf16.msra.mxu1 %v3849_v2 }
 0x182   : > { %3851 = vmatprep.subr.bf16.mxu1 %v3990_v3  ;;  %3874 = vmatpush3.bf16.msra.mxu0 %v3873_v5 }
 0x183   : > { %3875 = vmatprep.subr.bf16.mxu0 %v3990_v3 }
 0x185   : > { %3853 = vmatpush3.bf16.msra.mxu1 %v3852_v7 }
 0x186   : > { %3854 = vmatprep.subr.bf16.mxu1 %v3990_v3  ;;  %3877 = vmatpush3.bf16.msra.mxu0 %v3876_v31 }
 0x187   : > { %3878 = vmatprep.subr.bf16.mxu0 %v3990_v3 }
 0x189   : > { %3856 = vmatpush3.bf16.msra.mxu1 %v3855_v10 }
 0x18a   : > { %3857 = vmatprep.subr.bf16.mxu1 %v3990_v3  ;;  %3880 = vmatpush3.bf16.msra.mxu0 %v3879_v34 }
 0x18b   : > { %3881 = vmatprep.subr.bf16.mxu0 %v3990_v3 }
 0x18d   : > { %3859 = vmatpush3.bf16.msra.mxu1 %v3858_v13 }
 0x214   : > { %v1032_v35 = vpop.f32.mrb[16].mxu0  ;;  %v1105_v36 = vpop.f32.mrb[16].mxu1 }
 0x215   : > { %v1106_v37 = vadd.f32 %v1105_v36, %v1032_v35  ;;  %v3414_v38 = vpop.f32.mrb[17].mxu0  ;;  %v3421_v39 = vpop.f32.mrb[17].mxu1 }
 0x218   : > { %v1182_v40 = vpop.f32.mrb[18].mxu0  ;;  %v1260_v41 = vpop.f32.mrb[18].mxu1 }
 0x219   : > { %v1186_v42 = vadd.f32 %v1182_v40, %v1106_v37  ;;  %v3428_v43 = vpop.f32.mrb[19].mxu0  ;;  %v3435_v44 = vpop.f32.mrb[19].mxu1 }
 0x21a   : > { %v2903_v43 = vld [vmem:[%s4801_s7] sm:$0x1] }
 0x21b   : > { %v1264_v45 = vadd.f32 %v1260_v41, %v1186_v42 }
 0x21c   : > { %v1338_v46 = vpop.f32.mrb[20].mxu0  ;;  %v1416_v47 = vpop.f32.mrb[20].mxu1 }
 0x21d   : > { %v1342_v48 = vadd.f32 %v1338_v46, %v1264_v45  ;;  %v3442_v49 = vpop.f32.mrb[21].mxu0  ;;  %v3449_v50 = vpop.f32.mrb[21].mxu1 }
 0x21e   : > { %v3009_v49 = vld [vmem:[%s4804_s10 + $0x78] sm:$0xff] }
 0x21f   : > { %v1420_v51 = vadd.f32 %v1416_v47, %v1342_v48  ;;  %v3008_v48 = vld [vmem:[%s4804_s10 + $0x70] sm:$0xff] }
 0x220   : > { %v1494_v52 = vpop.f32.mrb[22].mxu0  ;;  %v1572_v53 = vpop.f32.mrb[22].mxu1  ;;  %v3882_v50 = vpack.c.bf16 %v3009_v49, %v3008_v48 }
 0x221   : > { %v1498_v3 = vadd.f32 %v1494_v52, %v1420_v51  ;;  %v3456_v54 = vpop.f32.mrb[23].mxu0  ;;  %v3463_v55 = vpop.f32.mrb[23].mxu1  ;;  %v2922_v51 = vld [vmem:[%s4803_s9] sm:$0x1] }
 0x222   : > { %3883 = vmatpush3.bf16.msra.mxu0 %v3882_v50  ;;  %v3010_v55 = vld [vmem:[%s4805_s11] sm:$0x1] }
 0x223   : > { %v1576_v56 = vadd.f32 %v1572_v53, %v1498_v3 }
 0x224   : > { %v1650_v30 = vpop.f32.mrb[24].mxu0  ;;  %v1728_v57 = vpop.f32.mrb[24].mxu1 }
 0x225   : > { %v1654_v58 = vadd.f32 %v1650_v30, %v1576_v56  ;;  %v3470_v59 = vpop.f32.mrb[25].mxu0  ;;  %v3477_v60 = vpop.f32.mrb[25].mxu1 }
 0x227   : > { %v1732_v61 = vadd.f32 %v1728_v57, %v1654_v58 }
 0x228   : > { %v1806_v62 = vpop.f32.mrb[26].mxu0  ;;  %v1884_v63 = vpop.f32.mrb[26].mxu1 }
 0x229   : > { %v1810_v0 = vadd.f32 %v1806_v62, %v1732_v61  ;;  %v3484_v1 = vpop.f32.mrb[27].mxu0  ;;  %v3491_v2 = vpop.f32.mrb[27].mxu1 }
 0x22b   : > { %v1888_v4 = vadd.f32 %v1884_v63, %v1810_v0 }
 0x22c   : > { %v1962_v6 = vpop.f32.mrb[28].mxu0  ;;  %v2040_v7 = vpop.f32.mrb[28].mxu1 }
 0x22d   : > { %v1966_v8 = vadd.f32 %v1962_v6, %v1888_v4  ;;  %v3498_v9 = vpop.f32.mrb[29].mxu0  ;;  %v3505_v10 = vpop.f32.mrb[29].mxu1 }
 0x22f   : > { %v2044_v11 = vadd.f32 %v2040_v7, %v1966_v8 }
 0x230   : > { %v2118_v12 = vpop.f32.mrb[30].mxu0  ;;  %v2196_v13 = vpop.f32.mrb[30].mxu1 }
 0x231   : > { %v2122_v14 = vadd.f32 %v2118_v12, %v2044_v11  ;;  %v3512_v15 = vpop.f32.mrb[31].mxu0  ;;  %v3519_v16 = vpop.f32.mrb[31].mxu1 }
 0x233   : > { %v2200_v17 = vadd.f32 %v2196_v13, %v2122_v14 }
 0x234   : > { %v2274_v18 = vpop.f32.mrb[32].mxu0  ;;  %v2352_v19 = vpop.f32.mrb[32].mxu1 }
 0x235   : > { %v2278_v20 = vadd.f32 %v2274_v18, %v2200_v17  ;;  %v3526_v21 = vpop.f32.mrb[33].mxu0  ;;  %v3533_v22 = vpop.f32.mrb[33].mxu1 }
 0x237   : > { %v2356_v23 = vadd.f32 %v2352_v19, %v2278_v20 }
 0x238   : > { %v2430_v24 = vpop.f32.mrb[34].mxu0  ;;  %v2508_v25 = vpop.f32.mrb[34].mxu1 }
 0x239   : > { %v2434_v26 = vadd.f32 %v2430_v24, %v2356_v23  ;;  %v3540_v27 = vpop.f32.mrb[35].mxu0  ;;  %v3547_v5 = vpop.f32.mrb[35].mxu1 }
 0x23b   : > { %v2512_v28 = vadd.f32 %v2508_v25, %v2434_v26 }
 0x23c   : > { %v2586_v29 = vpop.f32.mrb[36].mxu0  ;;  %v2664_v31 = vpop.f32.mrb[36].mxu1 }
 0x23d   : > { %v2590_v32 = vadd.f32 %v2586_v29, %v2512_v28  ;;  %v3554_v33 = vpop.f32.mrb[37].mxu0  ;;  %v3561_v34 = vpop.f32.mrb[37].mxu1 }
 0x23f   : > { %v2668_v35 = vadd.f32 %v2664_v31, %v2590_v32 }
 0x240   : > { %v2742_v36 = vpop.f32.mrb[38].mxu0  ;;  %v2820_v37 = vpop.f32.mrb[38].mxu1 }
 0x241   : > { %v2746_v38 = vadd.f32 %v2742_v36, %v2668_v35  ;;  %v3568_v39 = vpop.f32.mrb[39].mxu0  ;;  %v3575_v40 = vpop.f32.mrb[39].mxu1 }
 0x243   : > { %v2824_v41 = vadd.f32 %v2820_v37, %v2746_v38 }
 0x244   : > { %v2898_v42 = vpop.f32.mrb[40].mxu0 }
 0x245   : > { %v2902_v44 = vadd.f32 %v2898_v42, %v2824_v41  ;;  %v3582_v45 = vpop.f32.mrb[41].mxu0 }
 0x247   : > { %v2904_v46 = vadd.f32 %v2903_v43, %v2902_v44 }
 0x249   : > { %v2905_v47 = vmax.f32 %v2904_v46, 0.0 }
 0x24b   : > { %3616 = vmatmul.mubr.f32.vlgmr.msra.gmra.mrb[40].mxu1 %v2905_v47 }
 0x31e   : > { %v2989_v52 = vpop.f32.mrb[40].mxu1 }
 0x31f   : > { %v2990_v53 = vadd.f32 %v2989_v52, %v2922_v51  ;;  %v3617_v3 = vpop.f32.mrb[41].mxu1 }
 0x321   : > { %v2993_v54 = vmax.f32 %v2990_v53, 0.0 }
 0x323   : > { %3651 = vmatmul.mubr.f32.vlgmr.msra.gmra.mrb[42].mxu0 %v2993_v54 }
 0x3f6   : > { %v3077_v56 = vpop.f32.mrb[42].mxu0 }
 0x3f7   : > { %v3078_v30 = vadd.f32 %v3077_v56, %v3010_v55  ;;  %v3652_v57 = vpop.f32.mrb[43].mxu0 }
 0x3f9   : > { %3081 = vst [vmem:[%s450_s20] sm:$0x1] %v3078_v30 }
 0x3fa   : > { %3939 = shalt.err (!%p3936_p3)
}
 0x3fb   : > { %s3940_s23 = scalar_lea.hbm %s4752_s15, 16  ;;  %s3944_s19 = scalar_lea.hbm %s4806_s12, 32 }
 0x3fc   : > { %p3941_p4 = scmp.ne.s32.totalorder %s4752_s15, %s3940_s23  ;;  %p3945_p9 = scmp.lt.u32.totalorder %s4752_s15, %s4806_s12 }
 0x3fd   : > { %p3946_p10 = scmp.lt.u32.totalorder %s3944_s19, %s3940_s23  ;;  %p3948_p12 = scmp.lt.u32.totalorder %s3940_s23, %s4752_s15 }
 0x3fe   : > { %p3942_p7 = pnand %p3941_p4, %p4097_p5 }
 0x3ff   : > { %p3947_p11 = por %p3946_p10, %p3945_p9 }
 0x400   : > { %p3943_p8 = pneg %p3942_p7 }
 0x401   : > { %p3949_p13 = por %p3948_p12, %p3947_p11 }
 0x403   : > { %p3950_p0 = pnand %p3949_p13, %p3943_p8 }
 0x405   : > { %3953 = shalt.err (!%p3950_p0)
}
 0x406   : > { %3884 = dma.vmem_to_hbm [thread:$0]  (%p4097_p5), %s4754_s26, 16, %s4752_s15, %s3083_s29  }
 0x407 PF: > { %p3890_p1 = scmp.ge.s32.totalorder %s3988_s24, 2  ;;  %s3107_s16 = sand.u32 1, %s3976_s21  }
 0x408   : > { %s3108_s30 = scalar_lea.sflag [#allocation4], %s3107_s16 }
 0x409   : > { %p3887_p2 = pnand %p3890_p1, %p4101_p6 }
 0x40b   : > { %3971 = dma.done.wait (!%p3887_p2), %s3108_s30, 16  }
 0x40c   : > { %3973 = vsyncadd (!%p3887_p2), %s3108_s30, 4294967280  ;;  %s4812_s18 = sld [smem:[#allocation6_spill]]  ;;  %s4813_s23 = sld [smem:[#allocation7_spill]] }
 0x40d   : > { %p22_p3 = scmp.ge.s32.totalorder %s4084_s27, 4   ;;  %s4814_s21 = smov %s3980_s22 }
 0x40e   : > { %s4816_s24 = smov %s4084_s27 }
 0x40f   :  { %24 = sbr.rel (!%p22_p3) target bundleno = 3 (0x3), region = 136 }
 0x412   : > { %s4815_s22 = smov %s4812_s18 }
 0x416   :  { %3112 = vsyncpa [#allocation4], 1 }
 0x417   :  { %3114 = vsyncpa [#allocation4 + $0x1], 1 }

</bundles_post_ra>
